<compile_context>
chip_gen: v6e
topology: v6e:2x2x1
jax: 0.10.0
libtpu: 0.0.40
codegen_flags: <defaults>
</compile_context>

<pallas_src>
import numpy as np
import jax
import jax.numpy as jnp
from jax import lax
from jax.experimental import pallas as pl
from jax.experimental.pallas import tpu as pltpu

# Module hyper-parameters (match DSE_Loss defaults).
SIGMA = 10.0
T_POWER = 1
EPS = 1e-6
GAUSS_COEFF = 1.0 / (SIGMA * np.sqrt(2.0 * np.pi))
INV_2SIG2 = 1.0 / (2.0 * SIGMA ** 2)
# Padded rows are offset this far away so exp(-d^2/(2 sigma^2)) underflows to
# exactly 0 in f32 -> padded columns contribute nothing to valid-row sums and
# no in-kernel mask is needed.
PAD_SENTINEL = 1.0e5


def gauss_deg_kernel(xi_ref, xjt_ref, sqi_ref, sqj_ref, g_ref, deg_ref):
    """Pass 1: emit G tile and accumulate deg_i = rsqrt(sum_j G_ij).

    xi_ref:  (tile_m, D)     xjt_ref: (D, tile_c)
    sqi_ref: (tile_m, 1)     sqj_ref: (1, tile_c)
    g_ref:   (tile_m, tile_c) output block
    deg_ref: (tile_m, 1) accumulator, resident across the column-tile axis.
    """
    j = pl.program_id(1)

    @pl.when(j == 0)
    def _():
        deg_ref[...] = jnp.zeros_like(deg_ref)

    # Standard MXU matmul: lanes of xi contract against sublanes of x^T,
    # no per-tile relayout of the RHS.
    cross = jnp.dot(xi_ref[...], xjt_ref[...], preferred_element_type=jnp.float32)
    d2 = jnp.maximum(sqi_ref[...] + sqj_ref[...] - 2.0 * cross, 0.0)
    g = GAUSS_COEFF * jnp.exp(-d2 * INV_2SIG2)

    g_ref[...] = g
    deg_ref[...] += jnp.sum(g, axis=1, keepdims=True)

    @pl.when(j == pl.num_programs(1) - 1)
    def _():
        # Fused Deg = 1 / sqrt(rowsum); rsqrt goes to the EUP slot.
        deg_ref[...] = lax.rsqrt(deg_ref[...])


def rescale_kernel(g_ref, degi_ref, degj_ref, out_ref):
    """Pass 2: pure elementwise K_ij = deg_i * G_ij * deg_j (no exp, no matmul)."""
    out_ref[...] = g_ref[...] * degi_ref[...] * degj_ref[...]


def entropy_kernel(eig_ref, out_ref):
    """eig_ref: (1, N) eigenvalues -> out_ref: (1, 1) SMEM scalar DSE."""
    e = jnp.abs(eig_ref[...])
    if T_POWER != 1:        # static: skip the pow path for t == 1
        e = e ** T_POWER
    prob = e / jnp.sum(e) + EPS
    out_ref[0, 0] = -jnp.sum(prob * jnp.log2(prob))


def diffusion_matrix_pallas(x, *, tile_m=256, tile_c=512):
    """Given x [N, D] f32, return K = Deg @ G @ Deg, [N, N] f32."""
    n, d = x.shape

    # Clamp tiles for small problems, pad N so every tile is full.
    n128 = ((n + 127) // 128) * 128
    tile_m = min(tile_m, n128)
    tile_c = min(tile_c, n128)
    step = int(np.lcm(tile_m, tile_c))
    n_pad = ((n + step - 1) // step) * step

    if n_pad != n:
        # Sentinel rows: far from all real data -> G entries underflow to 0.
        x_p = jnp.full((n_pad, d), PAD_SENTINEL, jnp.float32).at[:n, :].set(x)
    else:
        x_p = x

    # One-time wrapper-side layout plumbing: transposed x and squared norms in
    # both (N,1) and (1,N) layouts so the kernels never transpose.
    x_t = jnp.transpose(x_p)                 # (D, n_pad)
    sq = jnp.sum(x_p * x_p, axis=1)
    sq_col = sq.reshape(n_pad, 1)
    sq_row = sq.reshape(1, n_pad)

    grid = (n_pad // tile_m, n_pad // tile_c)

    # Pass 1: G blocks to HBM + deg_i = 1/sqrt(sum_j G_ij).
    g_pad, deg = pl.pallas_call(
        gauss_deg_kernel,
        out_shape=(jax.ShapeDtypeStruct((n_pad, n_pad), jnp.float32),
                   jax.ShapeDtypeStruct((n_pad, 1), jnp.float32)),
        grid_spec=pltpu.PrefetchScalarGridSpec(
            num_scalar_prefetch=0,
            grid=grid,
            in_specs=[
                pl.BlockSpec((tile_m, d), lambda i, j: (i, 0)),   # xi
                pl.BlockSpec((d, tile_c), lambda i, j: (0, j)),   # x^T cols
                pl.BlockSpec((tile_m, 1), lambda i, j: (i, 0)),   # ||xi||^2
                pl.BlockSpec((1, tile_c), lambda i, j: (0, j)),   # ||xj||^2 (row layout)
            ],
            out_specs=[
                pl.BlockSpec((tile_m, tile_c), lambda i, j: (i, j)),  # G block
                pl.BlockSpec((tile_m, 1), lambda i, j: (i, 0)),       # deg accumulator
            ],
        ),
        compiler_params=pltpu.CompilerParams(
            dimension_semantics=("parallel", "arbitrary")),
    )(x_p, x_t, sq_col, sq_row)

    deg_row = deg.reshape(1, n_pad)   # wrapper-side layout plumbing (free)

    # Pass 2: K = Deg @ G @ Deg as an elementwise rescale of the stashed G.
    k_pad = pl.pallas_call(
        rescale_kernel,
        out_shape=jax.ShapeDtypeStruct((n_pad, n_pad), jnp.float32),
        grid_spec=pltpu.PrefetchScalarGridSpec(
            num_scalar_prefetch=0,
            grid=grid,
            in_specs=[
                pl.BlockSpec((tile_m, tile_c), lambda i, j: (i, j)),  # G block
                pl.BlockSpec((tile_m, 1), lambda i, j: (i, 0)),       # deg_i
                pl.BlockSpec((1, tile_c), lambda i, j: (0, j)),       # deg_j
            ],
            out_specs=pl.BlockSpec((tile_m, tile_c), lambda i, j: (i, j)),
        ),
        compiler_params=pltpu.CompilerParams(
            dimension_semantics=("parallel", "parallel")),
    )(g_pad, deg, deg_row)

    if n_pad != n:
        k_pad = k_pad[:n, :n]   # padded rows/cols never enter the spectrum
    return k_pad


def dse_loss(x, min_samples=5000, tile_m=256, tile_c=512):
    """Forward pass of DSE_Loss (sigma=10, t=1, eps=1e-6)."""
    assert x.ndim == 2, "DSE_Loss currently only supports tensors with 2 dimensions."
    n = x.shape[0]
    if n < min_samples:
        reps = int(min_samples // n + 1)
        x = jnp.tile(x, (reps, 1))   # matches torch .repeat(reps, 1)
    x = x.astype(jnp.float32)

    K = diffusion_matrix_pallas(x, tile_m=tile_m, tile_c=tile_c)

    # TODO(synk): symmetric eigendecomposition (torch.linalg.eigvalsh) has no Pallas
    # equivalent; computed with jnp.linalg.eigvalsh in plain JAX/XLA.
    eigvals = jnp.linalg.eigvalsh(K).reshape(1, -1).astype(jnp.float32)

    dse = pl.pallas_call(
        entropy_kernel,
        out_shape=jax.ShapeDtypeStruct((1, 1), jnp.float32),
        in_specs=[pl.BlockSpec(memory_space=pltpu.MemorySpace.VMEM)],
        out_specs=pl.BlockSpec(memory_space=pltpu.MemorySpace.SMEM),
    )(eigvals)
    return dse[0, 0]


def _dse_loss_ref(x, min_samples=5000):
    """Plain-JAX reference (same math, no Pallas) for a sanity check."""
    n = x.shape[0]
    if n < min_samples:
        x = jnp.tile(x, (int(min_samples // n + 1), 1))
    x = x.astype(jnp.float32)
    sq = jnp.sum(x * x, axis=1, keepdims=True)
    d2 = jnp.maximum(sq + sq.T - 2.0 * (x @ x.T), 0.0)
    G = GAUSS_COEFF * jnp.exp(-d2 * INV_2SIG2)
    deg = 1.0 / jnp.sqrt(jnp.sum(G, axis=1))
    K = deg[:, None] * G * deg[None, :]
    e = jnp.abs(jnp.linalg.eigvalsh(K)) ** T_POWER
    p = e / jnp.sum(e) + EPS
    return -jnp.sum(p * jnp.log2(p))


if __name__ == "__main__":
    key = jax.random.PRNGKey(0)
    x = jax.random.normal(key, (8, 32), dtype=jnp.float32)  # [batch=8, hidden=32]

    # min_samples=200 -> x repeated to N=208 rows -> padded to 256 internally
    # (tiles clamped to 256), exercising the G-stash pass, the sentinel padding
    # and the un-pad slice.
    out = dse_loss(x, min_samples=200)
    out = jax.block_until_ready(out)

    ref = jax.block_until_ready(_dse_loss_ref(x, min_samples=200))
    np.testing.assert_allclose(np.asarray(out), np.asarray(ref), rtol=1e-2, atol=1e-2)

    print("KERNEL_OK")
</pallas_src>

<mosaic_0001>
module attributes {stable_mosaic.version = 11 : i64} {
  func.func @gauss_deg_kernel(%arg0: i32, %arg1: i32, %arg2: memref<256x32xf32, #tpu.memory_space<vmem>>, %arg3: memref<32x256xf32, #tpu.memory_space<vmem>>, %arg4: memref<256x1xf32, #tpu.memory_space<vmem>>, %arg5: memref<1x256xf32, #tpu.memory_space<vmem>>, %arg6: memref<256x256xf32, #tpu.memory_space<vmem>>, %arg7: memref<256x1xf32, #tpu.memory_space<vmem>>) attributes {dimension_semantics = [#tpu.dimension_semantics<parallel>, #tpu.dimension_semantics<arbitrary>], iteration_bounds = array<i64: 1, 1>, scalar_prefetch = 0 : i64, scratch_operands = 0 : i64, tpu.core_type = #tpu.core_type<tc>, window_params = [{transform_indices = @transform_0, window_bounds = array<i64: 256, 32>}, {transform_indices = @transform_1, window_bounds = array<i64: 32, 256>}, {transform_indices = @transform_2, window_bounds = array<i64: 256, 1>}, {transform_indices = @transform_3, window_bounds = array<i64: 1, 256>}, {transform_indices = @transform_4, window_bounds = array<i64: 256, 256>}, {transform_indices = @transform_5, window_bounds = array<i64: 256, 1>}]} {
    %c0_i32 = arith.constant 0 : i32
    %0 = arith.cmpi eq, %arg1, %c0_i32 : i32
    %1 = arith.extui %0 : i1 to i32
    %c0_i32_0 = arith.constant 0 : i32
    %2 = arith.cmpi ne, %1, %c0_i32_0 : i32
    scf.if %2 {
      %cst_22 = arith.constant 0.000000e+00 : f32
      %32 = vector.broadcast %cst_22 : f32 to vector<256x1xf32>
      %c0_23 = arith.constant 0 : index
      %c0_24 = arith.constant 0 : index
      %33 = vector.load %arg7[%c0_23, %c0_24] : memref<256x1xf32, #tpu.memory_space<vmem>>, vector<256x1xf32>
      tpu.vector_store %arg7[%c0_23, %c0_24], %32 {strides = array<i32>} : memref<256x1xf32, #tpu.memory_space<vmem>>, vector<256x1xf32>,
    } else {
    }
    %c0 = arith.constant 0 : index
    %c0_1 = arith.constant 0 : index
    %3 = vector.load %arg2[%c0, %c0_1] : memref<256x32xf32, #tpu.memory_space<vmem>>, vector<256x32xf32>
    %c0_2 = arith.constant 0 : index
    %c0_3 = arith.constant 0 : index
    %4 = vector.load %arg3[%c0_2, %c0_3] : memref<32x256xf32, #tpu.memory_space<vmem>>, vector<32x256xf32>
    %cst = arith.constant dense<0.000000e+00> : vector<256x256xf32>
    %5 = tpu.matmul %3, %4, %cst {dimension_numbers = #tpu.dot_dimension_numbers<[1], [0], [0], [1], [0, 0, 1, 1], [], []>} : vector<256x32xf32>, vector<32x256xf32>, vector<256x256xf32> -> vector<256x256xf32>
    %c0_4 = arith.constant 0 : index
    %c0_5 = arith.constant 0 : index
    %6 = vector.load %arg4[%c0_4, %c0_5] : memref<256x1xf32, #tpu.memory_space<vmem>>, vector<256x1xf32>
    %c0_6 = arith.constant 0 : index
    %c0_7 = arith.constant 0 : index
    %7 = vector.load %arg5[%c0_6, %c0_7] : memref<1x256xf32, #tpu.memory_space<vmem>>, vector<1x256xf32>
    %8 = vector.broadcast %6 : vector<256x1xf32> to vector<256x256xf32>
    %9 = vector.broadcast %7 : vector<1x256xf32> to vector<256x256xf32>
    %10 = arith.addf %8, %9 : vector<256x256xf32>
    %cst_8 = arith.constant 2.000000e+00 : f32
    %11 = vector.broadcast %cst_8 : f32 to vector<256x256xf32>
    %12 = arith.mulf %11, %5 : vector<256x256xf32>
    %13 = arith.subf %10, %12 : vector<256x256xf32>
    %cst_9 = arith.constant 0.000000e+00 : f32
    %14 = vector.broadcast %cst_9 : f32 to vector<256x256xf32>
    %15 = arith.maximumf %13, %14 : vector<256x256xf32>
    %cst_10 = arith.constant 0.000000e+00 : f32
    %16 = vector.broadcast %cst_10 : f32 to vector<256x256xf32>
    %17 = arith.subf %16, %15 : vector<256x256xf32>
    %cst_11 = arith.constant 5.000000e-03 : f32
    %18 = vector.broadcast %cst_11 : f32 to vector<256x256xf32>
    %19 = arith.mulf %17, %18 : vector<256x256xf32>
    %20 = math.exp %19 : vector<256x256xf32>
    %cst_12 = arith.constant 0.0398942269 : f32
    %21 = vector.broadcast %cst_12 : f32 to vector<256x256xf32>
    %22 = arith.mulf %21, %20 : vector<256x256xf32>
    %c0_13 = arith.constant 0 : index
    %c0_14 = arith.constant 0 : index
    %23 = vector.load %arg6[%c0_13, %c0_14] : memref<256x256xf32, #tpu.memory_space<vmem>>, vector<256x256xf32>
    tpu.vector_store %arg6[%c0_13, %c0_14], %22 {strides = array<i32>} : memref<256x256xf32, #tpu.memory_space<vmem>>, vector<256x256xf32>,
    %c0_15 = arith.constant 0 : index
    %c0_16 = arith.constant 0 : index
    %24 = vector.load %arg7[%c0_15, %c0_16] : memref<256x1xf32, #tpu.memory_space<vmem>>, vector<256x1xf32>
    %cst_17 = arith.constant dense<0.000000e+00> : vector<256xf32>
    %25 = vector.multi_reduction <add>, %22, %cst_17 [1] : vector<256x256xf32> to vector<256xf32>
    %26 = vector.shape_cast %25 : vector<256xf32> to vector<256x1xf32>
    %27 = arith.addf %24, %26 : vector<256x1xf32>
    %c0_18 = arith.constant 0 : index
    %c0_19 = arith.constant 0 : index
    %28 = vector.load %arg7[%c0_18, %c0_19] : memref<256x1xf32, #tpu.memory_space<vmem>>, vector<256x1xf32>
    tpu.vector_store %arg7[%c0_18, %c0_19], %27 {strides = array<i32>} : memref<256x1xf32, #tpu.memory_space<vmem>>, vector<256x1xf32>,
    %c0_i32_20 = arith.constant 0 : i32
    %29 = arith.cmpi eq, %arg1, %c0_i32_20 : i32
    %30 = arith.extui %29 : i1 to i32
    %c0_i32_21 = arith.constant 0 : i32
    %31 = arith.cmpi ne, %30, %c0_i32_21 : i32
    scf.if %31 {
      %c0_22 = arith.constant 0 : index
      %c0_23 = arith.constant 0 : index
      %32 = vector.load %arg7[%c0_22, %c0_23] : memref<256x1xf32, #tpu.memory_space<vmem>>, vector<256x1xf32>
      %33 = math.rsqrt %32 : vector<256x1xf32>
      %c0_24 = arith.constant 0 : index
      %c0_25 = arith.constant 0 : index
      %34 = vector.load %arg7[%c0_24, %c0_25] : memref<256x1xf32, #tpu.memory_space<vmem>>, vector<256x1xf32>
      tpu.vector_store %arg7[%c0_24, %c0_25], %33 {strides = array<i32>} : memref<256x1xf32, #tpu.memory_space<vmem>>, vector<256x1xf32>,
    } else {
    }
    return
  }
  func.func @transform_0(%arg0: i32, %arg1: i32) -> (i32, i32) {
    %c0_i32 = arith.constant 0 : i32
    %c0_i32_0 = arith.constant 0 : i32
    return %arg0, %c0_i32 : i32, i32
  }
  func.func @transform_1(%arg0: i32, %arg1: i32) -> (i32, i32) {
    %c0_i32 = arith.constant 0 : i32
    %c0_i32_0 = arith.constant 0 : i32
    return %c0_i32, %arg1 : i32, i32
  }
  func.func @transform_2(%arg0: i32, %arg1: i32) -> (i32, i32) {
    %c0_i32 = arith.constant 0 : i32
    %c0_i32_0 = arith.constant 0 : i32
    return %arg0, %c0_i32 : i32, i32
  }
  func.func @transform_3(%arg0: i32, %arg1: i32) -> (i32, i32) {
    %c0_i32 = arith.constant 0 : i32
    %c0_i32_0 = arith.constant 0 : i32
    return %c0_i32, %arg1 : i32, i32
  }
  func.func @transform_4(%arg0: i32, %arg1: i32) -> (i32, i32) {
    %c0_i32 = arith.constant 0 : i32
    return %arg0, %arg1 : i32, i32
  }
  func.func @transform_5(%arg0: i32, %arg1: i32) -> (i32, i32) {
    %c0_i32 = arith.constant 0 : i32
    %c0_i32_0 = arith.constant 0 : i32
    return %arg0, %c0_i32 : i32, i32
  }
}

</mosaic_0001>

<bundles_post_ra>
// kernel: tpu_custom_call.1
= control target key start
LH: loop header
LB: loop body
LE: loop exit
PB: predicated region body
PF: predicated region fallthrough
CT: control target
= control target key end

     0   :  { %v1868_v3 = vmov 0   ;;  %vm97_vm0 = vcmask 261120   ;;  %v3236_v17 = vmov 0.0   ;;  %s3230_s0 = inlined_call_operand.vmem [shape: f32[256,32], index: 0, kind: input, shape index: {}]   ;;  %s3231_s1 = inlined_call_operand.vmem [shape: f32[32,256], index: 1, kind: input, shape index: {}]   ;;  %s3232_s2 = inlined_call_operand.vmem [shape: f32[256,1], index: 2, kind: input, shape index: {}]   ;;  %s3233_s3 = inlined_call_operand.vmem [shape: f32[1,256], index: 3, kind: input, shape index: {}]   ;;  %s3234_s4 = inlined_call_operand.hbm [shape: f32[256,256], index: 4, kind: output, shape index: {0}]   ;;  %s3235_s5 = inlined_call_operand.vmem [shape: f32[256,1], index: 5, kind: output, shape index: {1}]  }
   0x1   :  { %v96_v0 = vld [vmem:[%s3231_s1 + $0x38] sm:$0xff]  ;;  %v453_v1 = vld [vmem:[%s3232_s2 + $0x10] sm:$0xff]  ;;  %v451_v2 = vld [vmem:[%s3232_s2] sm:$0xff]  ;;  %1653 = vset.pattern.permute.xlu1 %v1868_v3  ;;  %1652 = vset.pattern.permute.xlu0 %v1868_v3 }
   0x2   :  { %v95_v4 = vld [vmem:[%s3231_s1 + $0x30] sm:$0xff]  ;;  %218 = vmatprep.subr.mxu0 %v96_v0  ;;  %1639 = vmatprep.subr.mxu1 %v96_v0  ;;  %v94_v5 = vld [vmem:[%s3231_s1 + $0x28] sm:$0xff]  ;;  %v93_v6 = vld [vmem:[%s3231_s1 + $0x20] sm:$0xff] }
   0x3   :  { %496 = vperm.xlu1 %1653, %v453_v1   ;;  %486 = vperm.xlu0 %1652, %v451_v2   ;;  %v92_v7 = vld [vmem:[%s3231_s1 + $0x18] sm:$0xff]  ;;  %v452_v9 = vld [vmem:[%s3232_s2 + $0x8] sm:$0xff]  ;;  %v91_v10 = vld [vmem:[%s3231_s1 + $0x10] sm:$0xff] }
   0x4   :  { %219 = vmatpush1.msra.mxu0 %v95_v4  ;;  %1643 = vmatpush1.msra.mxu1 %v95_v4  ;;  %v454_v8 = vld [vmem:[%s3232_s2 + $0x18] sm:$0xff]  ;;  %v90_v11 = vld [vmem:[%s3231_s1 + $0x8] sm:$0xff]  ;;  %v89_v12 = vld [vmem:[%s3231_s1] sm:$0xff] }
   0x5   :  { %220 = vmatprep.subr.mxu0 %v94_v5  ;;  %1640 = vmatprep.subr.mxu1 %v94_v5  ;;  %v57_v13 = vld [vmem:[%s3230_s0] sm:$0xff]  ;;  %v456_v15 = vld [vmem:[%s3232_s2 + $0x28] sm:$0xff]  ;;  %v458_v20 = vld [vmem:[%s3232_s2 + $0x38] sm:$0xff] }
   0x6   :  { %221 = vmatpush1.msra.mxu0 %v93_v6  ;;  %1644 = vmatpush1.msra.mxu1 %v93_v6  ;;  %v73_v14 = vld [vmem:[%s3230_s0 + $0x80] sm:$0xff]  ;;  %v58_v18 = vld [vmem:[%s3230_s0 + $0x8] sm:$0xff]  ;;  %v457_v21 = vld [vmem:[%s3232_s2 + $0x30] sm:$0xff] }
   0x7   :  { %222 = vmatprep.subr.mxu0 %v92_v7  ;;  %1641 = vmatprep.subr.mxu1 %v92_v7  ;;  %v455_v16 = vld [vmem:[%s3232_s2 + $0x20] sm:$0xff]  ;;  %v74_v19 = vld [vmem:[%s3230_s0 + $0x88] sm:$0xff]  ;;  %v59_v22 = vld [vmem:[%s3230_s0 + $0x10] sm:$0xff] }
   0x8   :  { %501 = vperm.xlu1 %1653, %v454_v8   ;;  %491 = vperm.xlu0 %1652, %v452_v9   ;;  %v75_v23 = vld [vmem:[%s3230_s0 + $0x90] sm:$0xff]  ;;  %v460_v24 = vld [vmem:[%s3232_s2 + $0x48] sm:$0xff]  ;;  %v459_v25 = vld [vmem:[%s3232_s2 + $0x40] sm:$0xff] }
   0x9   :  { %223 = vmatpush1.msra.mxu0 %v91_v10  ;;  %1645 = vmatpush1.msra.mxu1 %v91_v10  ;;  %v60_v26 = vld [vmem:[%s3230_s0 + $0x18] sm:$0xff]  ;;  %v461_v29 = vld [vmem:[%s3232_s2 + $0x50] sm:$0xff] }
   0xa   :  { %224 = vmatprep.subr.mxu0 %v90_v11  ;;  %1642 = vmatprep.subr.mxu1 %v90_v11  ;;  %v76_v27 = vld [vmem:[%s3230_s0 + $0x98] sm:$0xff] }
   0xb   :  { %225 = vmatpush1.msra.mxu0 %v89_v12  ;;  %1646 = vmatpush1.msra.mxu1 %v89_v12  ;;  %v462_v28 = vld [vmem:[%s3232_s2 + $0x58] sm:$0xff] }
   0xc   :  { %258 = vmatprep.mubr.f32.mxu0 %v3236_v17  ;;  %354 = vmatprep.mubr.f32.mxu1 %v3236_v17 }
   0xd   :  { %1607 = vmatmul.mubr.msk.f32.vlgmr.msra.gmra.mxu0 %vm97_vm0, %v57_v13  ;;  %1623 = vmatmul.mubr.msk.f32.vlgmr.msra.gmra.mxu1 %vm97_vm0, %v73_v14 }
   0xe   :  { %511 = vperm.xlu1 %1653, %v456_v15   ;;  %506 = vperm.xlu0 %1652, %v455_v16  }
   0xf   :  { %264 = vmatprep.mubr.f32.mxu0 %v3236_v17  ;;  %360 = vmatprep.mubr.f32.mxu1 %v3236_v17 }
  0x11   :  { %1608 = vmatmul.mubr.msk.f32.gmra.mxu0 %vm97_vm0, %v58_v18  ;;  %1624 = vmatmul.mubr.msk.f32.gmra.mxu1 %vm97_vm0, %v74_v19 }
  0x12   :  { %521 = vperm.xlu1 %1653, %v458_v20   ;;  %516 = vperm.xlu0 %1652, %v457_v21  }
  0x13   :  { %270 = vmatprep.mubr.f32.mxu0 %v3236_v17  ;;  %366 = vmatprep.mubr.f32.mxu1 %v3236_v17 }
  0x15   :  { %1609 = vmatmul.mubr.msk.f32.gmra.mxu0 %vm97_vm0, %v59_v22  ;;  %1625 = vmatmul.mubr.msk.f32.gmra.mxu1 %vm97_vm0, %v75_v23 }
  0x16   :  { %531 = vperm.xlu1 %1653, %v460_v24   ;;  %526 = vperm.xlu0 %1652, %v459_v25  }
  0x17   :  { %276 = vmatprep.mubr.f32.mxu0 %v3236_v17  ;;  %372 = vmatprep.mubr.f32.mxu1 %v3236_v17 }
  0x18   :  { %11 = vsyncpa [#allocation3], 0  ;;  %v61_v30 = vld [vmem:[%s3230_s0 + $0x20] sm:$0xff]  ;;  %v464_v32 = vld [vmem:[%s3232_s2 + $0x68] sm:$0xff]  ;;  %v645_v12 = vlaneseq  ;;  %vm24_vm1 = vcmask 7168   ;;  %s1870_s12 = smov [#allocation2]  }
  0x19   :  { %1610 = vmatmul.mubr.msk.f32.gmra.mxu0 %vm97_vm0, %v60_v26  ;;  %1626 = vmatmul.mubr.msk.f32.gmra.mxu1 %vm97_vm0, %v76_v27  ;;  %v77_v31 = vld [vmem:[%s3230_s0 + $0xa0] sm:$0xff]  ;;  %v62_v34 = vld [vmem:[%s3230_s0 + $0x28] sm:$0xff]  ;;  %v466_v36 = vld [vmem:[%s3232_s2 + $0x78] sm:$0xff]  ;;  %s1592_s13 = sshll.u32 %s1870_s12, 4  ;;  %s1593_s13 = int_to_ptr.vmem [resolvable:$true] %s1592_s13 }
  0x1a   :  { %541 = vperm.xlu1 %1653, %v462_v28   ;;  %536 = vperm.xlu0 %1652, %v461_v29   ;;  %v463_v33 = vld [vmem:[%s3232_s2 + $0x60] sm:$0xff]  ;;  %v78_v35 = vld [vmem:[%s3230_s0 + $0xa8] sm:$0xff]  ;;  %v465_v37 = vld [vmem:[%s3232_s2 + $0x70] sm:$0xff]  ;;  %v646_v15 = vshrl.u32 %v645_v12, 7  ;;  %s1846_s14 = scalar_lea.vmem %s1593_s13, 8192  ;;  %p1851_p1 = scmp.lt.s32.totalorder %s1593_s13, %s1593_s13 }
  0x1b   :  { %282 = vmatprep.mubr.f32.mxu0 %v3236_v17  ;;  %378 = vmatprep.mubr.f32.mxu1 %v3236_v17  ;;  %v63_v38 = vld [vmem:[%s3230_s0 + $0x30] sm:$0xff]  ;;  %v468_v40 = vld [vmem:[%s3232_s2 + $0x88] sm:$0xff]  ;;  %v467_v41 = vld [vmem:[%s3232_s2 + $0x80] sm:$0xff]  ;;  %p1847_p0 = scmp.ne.s32.totalorder %s1593_s13, %s1846_s14  ;;  %p1852_p2 = scmp.lt.s32.totalorder %s1846_s14, %s1846_s14 }
  0x1c   :  { %v79_v39 = vld [vmem:[%s3230_s0 + $0xb0] sm:$0xff]  ;;  %v64_v42 = vld [vmem:[%s3230_s0 + $0x38] sm:$0xff]  ;;  %v65_v46 = vld [vmem:[%s3230_s0 + $0x40] sm:$0xff]  ;;  %v647_v19 = vsub.s32 0, %v646_v15  ;;  %v651_v20 = vsub.s32 1, %v646_v15 }
  0x1d   :  { %1611 = vmatmul.mubr.msk.f32.gmra.mxu0 %vm97_vm0, %v61_v30  ;;  %1627 = vmatmul.mubr.msk.f32.gmra.mxu1 %vm97_vm0, %v77_v31  ;;  %v80_v43 = vld [vmem:[%s3230_s0 + $0xb8] sm:$0xff]  ;;  %v469_v45 = vld [vmem:[%s3232_s2 + $0x90] sm:$0xff]  ;;  %v81_v47 = vld [vmem:[%s3230_s0 + $0xc0] sm:$0xff]  ;;  %p1853_p3 = por %p1852_p2, %p1851_p1 }
  0x1e   :  { %551 = vperm.xlu1 %1653, %v464_v32   ;;  %546 = vperm.xlu0 %1652, %v463_v33   ;;  %v470_v44 = vld [vmem:[%s3232_s2 + $0x98] sm:$0xff]  ;;  %v472_v48 = vld [vmem:[%s3232_s2 + $0xa8] sm:$0xff]  ;;  %v471_v49 = vld [vmem:[%s3232_s2 + $0xa0] sm:$0xff] }
  0x1f   :  { %288 = vmatprep.mubr.f32.mxu0 %v3236_v17  ;;  %384 = vmatprep.mubr.f32.mxu1 %v3236_v17  ;;  %v66_v50 = vld [vmem:[%s3230_s0 + $0x48] sm:$0xff]  ;;  %v474_v52 = vld [vmem:[%s3232_s2 + $0xb8] sm:$0xff]  ;;  %v473_v53 = vld [vmem:[%s3232_s2 + $0xb0] sm:$0xff]  ;;  %p1854_p4 = pnand %p1853_p3, %p1847_p0 }
  0x20   :  { %v82_v51 = vld [vmem:[%s3230_s0 + $0xc8] sm:$0xff]  ;;  %v67_v54 = vld [vmem:[%s3230_s0 + $0x50] sm:$0xff]  ;;  %v475_v57 = vld [vmem:[%s3232_s2 + $0xc0] sm:$0xff] }
  0x21   :  { %1612 = vmatmul.mubr.msk.f32.gmra.mxu0 %vm97_vm0, %v62_v34  ;;  %1628 = vmatmul.mubr.msk.f32.gmra.mxu1 %vm97_vm0, %v78_v35  ;;  %v83_v55 = vld [vmem:[%s3230_s0 + $0xd0] sm:$0xff]  ;;  %v476_v56 = vld [vmem:[%s3232_s2 + $0xc8] sm:$0xff]  ;;  %v68_v58 = vld [vmem:[%s3230_s0 + $0x58] sm:$0xff] }
  0x22   :  { %561 = vperm.xlu1 %1653, %v466_v36   ;;  %556 = vperm.xlu0 %1652, %v465_v37   ;;  %v84_v59 = vld [vmem:[%s3230_s0 + $0xd8] sm:$0xff]  ;;  %v477_v61 = vld [vmem:[%s3232_s2 + $0xd0] sm:$0xff]  ;;  %v69_v62 = vld [vmem:[%s3230_s0 + $0x60] sm:$0xff] }
  0x23   :  { %294 = vmatprep.mubr.f32.mxu0 %v3236_v17  ;;  %390 = vmatprep.mubr.f32.mxu1 %v3236_v17  ;;  %v478_v60 = vld [vmem:[%s3232_s2 + $0xd8] sm:$0xff]  ;;  %v85_v63 = vld [vmem:[%s3230_s0 + $0xe0] sm:$0xff]  ;;  %v480_v0 = vld [vmem:[%s3232_s2 + $0xe8] sm:$0xff] }
  0x24   :  { %v479_v1 = vld [vmem:[%s3232_s2 + $0xe0] sm:$0xff]  ;;  %v70_v2 = vld [vmem:[%s3230_s0 + $0x68] sm:$0xff]  ;;  %v482_v4 = vld [vmem:[%s3232_s2 + $0xf8] sm:$0xff] }
  0x25   :  { %1613 = vmatmul.mubr.msk.f32.gmra.mxu0 %vm97_vm0, %v63_v38  ;;  %1629 = vmatmul.mubr.msk.f32.gmra.mxu1 %vm97_vm0, %v79_v39  ;;  %v86_v3 = vld [vmem:[%s3230_s0 + $0xe8] sm:$0xff]  ;;  %v481_v5 = vld [vmem:[%s3232_s2 + $0xf0] sm:$0xff]  ;;  %v72_v8 = vld [vmem:[%s3230_s0 + $0x78] sm:$0xff] }
  0x26   :  { %571 = vperm.xlu1 %1653, %v468_v40   ;;  %566 = vperm.xlu0 %1652, %v467_v41   ;;  %v71_v6 = vld [vmem:[%s3230_s0 + $0x70] sm:$0xff]  ;;  %v88_v9 = vld [vmem:[%s3230_s0 + $0xf8] sm:$0xff]  ;;  %v483_v21 = vld [vmem:[%s3233_s3] sm:$0x3] }
  0x27   :  { %300 = vmatprep.mubr.f32.mxu0 %v3236_v17  ;;  %396 = vmatprep.mubr.f32.mxu1 %v3236_v17  ;;  %v87_v7 = vld [vmem:[%s3230_s0 + $0xf0] sm:$0xff]  ;;  %v2186_v24 = vrot.slane %v483_v21, %v647_v19  ;;  %v2188_v25 = vrot.slane %v483_v21, %v651_v20 }
  0x29   :  { %1614 = vmatmul.mubr.msk.f32.gmra.mxu0 %vm97_vm0, %v64_v42  ;;  %1630 = vmatmul.mubr.msk.f32.gmra.mxu1 %vm97_vm0, %v80_v43 }
  0x2a   :  { %581 = vperm.xlu1 %1653, %v470_v44   ;;  %576 = vperm.xlu0 %1652, %v469_v45  }
  0x2b   :  { %306 = vmatprep.mubr.f32.mxu0 %v3236_v17  ;;  %402 = vmatprep.mubr.f32.mxu1 %v3236_v17 }
  0x2d   :  { %1615 = vmatmul.mubr.msk.f32.gmra.mxu0 %vm97_vm0, %v65_v46  ;;  %1631 = vmatmul.mubr.msk.f32.gmra.mxu1 %vm97_vm0, %v81_v47 }
  0x2e   :  { %591 = vperm.xlu1 %1653, %v472_v48   ;;  %586 = vperm.xlu0 %1652, %v471_v49  }
  0x2f   :  { %312 = vmatprep.mubr.f32.mxu0 %v3236_v17  ;;  %408 = vmatprep.mubr.f32.mxu1 %v3236_v17 }
  0x31   :  { %1616 = vmatmul.mubr.msk.f32.gmra.mxu0 %vm97_vm0, %v66_v50  ;;  %1632 = vmatmul.mubr.msk.f32.gmra.mxu1 %vm97_vm0, %v82_v51 }
  0x32   :  { %601 = vperm.xlu1 %1653, %v474_v52   ;;  %596 = vperm.xlu0 %1652, %v473_v53  }
  0x33   :  { %318 = vmatprep.mubr.f32.mxu0 %v3236_v17  ;;  %414 = vmatprep.mubr.f32.mxu1 %v3236_v17 }
  0x35   :  { %1617 = vmatmul.mubr.msk.f32.gmra.mxu0 %vm97_vm0, %v67_v54  ;;  %1633 = vmatmul.mubr.msk.f32.gmra.mxu1 %vm97_vm0, %v83_v55 }
  0x36   :  { %611 = vperm.xlu1 %1653, %v476_v56   ;;  %606 = vperm.xlu0 %1652, %v475_v57  }
  0x37   :  { %324 = vmatprep.mubr.f32.mxu0 %v3236_v17  ;;  %420 = vmatprep.mubr.f32.mxu1 %v3236_v17 }
  0x39   :  { %1618 = vmatmul.mubr.msk.f32.gmra.mxu0 %vm97_vm0, %v68_v58  ;;  %1634 = vmatmul.mubr.msk.f32.gmra.mxu1 %vm97_vm0, %v84_v59 }
  0x3a   :  { %621 = vperm.xlu1 %1653, %v478_v60   ;;  %616 = vperm.xlu0 %1652, %v477_v61  }
  0x3b   :  { %330 = vmatprep.mubr.f32.mxu0 %v3236_v17  ;;  %426 = vmatprep.mubr.f32.mxu1 %v3236_v17 }
  0x3d   :  { %1619 = vmatmul.mubr.msk.f32.gmra.mxu0 %vm97_vm0, %v69_v62  ;;  %1635 = vmatmul.mubr.msk.f32.gmra.mxu1 %vm97_vm0, %v85_v63 }
  0x3e   :  { %631 = vperm.xlu1 %1653, %v480_v0   ;;  %626 = vperm.xlu0 %1652, %v479_v1  }
  0x3f   :  { %336 = vmatprep.mubr.f32.mxu0 %v3236_v17  ;;  %432 = vmatprep.mubr.f32.mxu1 %v3236_v17 }
  0x41   :  { %1620 = vmatmul.mubr.msk.f32.gmra.mxu0 %vm97_vm0, %v70_v2  ;;  %1636 = vmatmul.mubr.msk.f32.gmra.mxu1 %vm97_vm0, %v86_v3 }
  0x42   :  { %641 = vperm.xlu1 %1653, %v482_v4   ;;  %636 = vperm.xlu0 %1652, %v481_v5  }
  0x43   :  { %342 = vmatprep.mubr.f32.mxu0 %v3236_v17  ;;  %438 = vmatprep.mubr.f32.mxu1 %v3236_v17 }
  0x45   :  { %1621 = vmatmul.mubr.msk.f32.gmra.mxu0 %vm97_vm0, %v71_v6  ;;  %1637 = vmatmul.mubr.msk.f32.gmra.mxu1 %vm97_vm0, %v87_v7 }
  0x46   :  { %348 = vmatprep.mubr.f32.mxu0 %v3236_v17  ;;  %444 = vmatprep.mubr.f32.mxu1 %v3236_v17 }
  0x49   :  { %1622 = vmatmul.mubr.msk.f32.gmra.mxu0 %vm97_vm0, %v72_v8  ;;  %1638 = vmatmul.mubr.msk.f32.gmra.mxu1 %vm97_vm0, %v88_v9 }
  0x7e   :  { %v497_v10 = vpop.permute.xlu1 %496  ;;  %v487_v11 = vpop.permute.xlu0 %486 }
  0x7f   :  { %v2239_v60 = vadd.f32 %v2186_v24, %v497_v10  ;;  %v2242_v61 = vadd.f32 %v2188_v25, %v497_v10  ;;  %v655_v62 = vadd.f32 %v2186_v24, %v487_v11  ;;  %v2246_v63 = vadd.f32 %v2188_v25, %v487_v11 }
  0x83   :  { %v502_v13 = vpop.permute.xlu1 %501  ;;  %v492_v14 = vpop.permute.xlu0 %491 }
  0x84   :  { %v2249_v0 = vadd.f32 %v2186_v24, %v502_v13  ;;  %v2252_v1 = vadd.f32 %v2188_v25, %v502_v13  ;;  %v2255_v2 = vadd.f32 %v2186_v24, %v492_v14  ;;  %v2258_v3 = vadd.f32 %v2188_v25, %v492_v14 }
  0x89   :  { %v512_v16 = vpop.permute.xlu1 %511  ;;  %v507_v18 = vpop.permute.xlu0 %506 }
  0x8a   :  { %v2261_v4 = vadd.f32 %v2186_v24, %v512_v16  ;;  %v2264_v5 = vadd.f32 %v2188_v25, %v512_v16  ;;  %v2267_v6 = vadd.f32 %v2186_v24, %v507_v18  ;;  %v2270_v7 = vadd.f32 %v2188_v25, %v507_v18 }
  0x8d   :  { %v522_v22 = vpop.permute.xlu1 %521  ;;  %v517_v23 = vpop.permute.xlu0 %516 }
  0x8e   :  { %v2273_v9 = vadd.f32 %v2186_v24, %v522_v22  ;;  %v2276_v10 = vadd.f32 %v2188_v25, %v522_v22  ;;  %v2279_v11 = vadd.f32 %v2186_v24, %v517_v23  ;;  %v2282_v12 = vadd.f32 %v2188_v25, %v517_v23 }
  0x91   :  { %v532_v26 = vpop.permute.xlu1 %531  ;;  %v527_v27 = vpop.permute.xlu0 %526 }
  0x92   :  { %v2191_v28 = vadd.f32 %v2186_v24, %v532_v26  ;;  %v2194_v29 = vadd.f32 %v2188_v25, %v532_v26  ;;  %v2197_v30 = vadd.f32 %v2186_v24, %v527_v27  ;;  %v2200_v31 = vadd.f32 %v2188_v25, %v527_v27 }
  0x95   :  { %v542_v32 = vpop.permute.xlu1 %541  ;;  %v537_v33 = vpop.permute.xlu0 %536 }
  0x96   :  { %v2203_v34 = vadd.f32 %v2186_v24, %v542_v32  ;;  %v2206_v35 = vadd.f32 %v2188_v25, %v542_v32  ;;  %v2209_v36 = vadd.f32 %v2186_v24, %v537_v33  ;;  %v2212_v37 = vadd.f32 %v2188_v25, %v537_v33 }
  0x98   :  { %3238 = vst [vmem:[#allocation5_spill] sm:$0xff] %v2203_v34  ;;  %3239 = vst [vmem:[#allocation6_spill] sm:$0xff] %v2206_v35 }
  0x99   :  { %3240 = vst [vmem:[#allocation7_spill] sm:$0xff] %v2209_v36  ;;  %3241 = vst [vmem:[#allocation8_spill] sm:$0xff] %v2212_v37  ;;  %v552_v38 = vpop.permute.xlu1 %551  ;;  %v547_v39 = vpop.permute.xlu0 %546 }
  0x9a   :  { %v2215_v40 = vadd.f32 %v2186_v24, %v552_v38  ;;  %v2218_v41 = vadd.f32 %v2188_v25, %v552_v38  ;;  %v2221_v42 = vadd.f32 %v2186_v24, %v547_v39  ;;  %v2224_v43 = vadd.f32 %v2188_v25, %v547_v39 }
  0x9c   :  { %3242 = vst [vmem:[#allocation9_spill] sm:$0xff] %v2215_v40  ;;  %3243 = vst [vmem:[#allocation10_spill] sm:$0xff] %v2218_v41 }
  0x9d   :  { %3244 = vst [vmem:[#allocation11_spill] sm:$0xff] %v2221_v42  ;;  %3245 = vst [vmem:[#allocation12_spill] sm:$0xff] %v2224_v43  ;;  %v562_v44 = vpop.permute.xlu1 %561  ;;  %v557_v45 = vpop.permute.xlu0 %556 }
  0x9e   :  { %v2227_v46 = vadd.f32 %v2186_v24, %v562_v44  ;;  %v2230_v47 = vadd.f32 %v2188_v25, %v562_v44  ;;  %v2233_v48 = vadd.f32 %v2186_v24, %v557_v45  ;;  %v2236_v49 = vadd.f32 %v2188_v25, %v557_v45 }
  0xa0   :  { %3246 = vst [vmem:[#allocation13_spill] sm:$0xff] %v2227_v46  ;;  %3247 = vst [vmem:[#allocation14_spill] sm:$0xff] %v2230_v47 }
  0xa1   :  { %3248 = vst [vmem:[#allocation15_spill] sm:$0xff] %v2233_v48  ;;  %3249 = vst [vmem:[#allocation16_spill] sm:$0xff] %v2236_v49  ;;  %v572_v50 = vpop.permute.xlu1 %571  ;;  %v567_v51 = vpop.permute.xlu0 %566 }
  0xa2   :  { %v2285_v13 = vadd.f32 %v2186_v24, %v572_v50  ;;  %v2288_v14 = vadd.f32 %v2188_v25, %v572_v50  ;;  %v687_v15 = vadd.f32 %v2186_v24, %v567_v51  ;;  %v688_v16 = vadd.f32 %v2188_v25, %v567_v51 }
  0xa5   :  { %v582_v52 = vpop.permute.xlu1 %581  ;;  %v577_v53 = vpop.permute.xlu0 %576 }
  0xa6   :  { %v2293_v19 = vadd.f32 %v2186_v24, %v582_v52  ;;  %v2296_v20 = vadd.f32 %v2188_v25, %v582_v52  ;;  %v2299_v21 = vadd.f32 %v2186_v24, %v577_v53  ;;  %v2302_v22 = vadd.f32 %v2188_v25, %v577_v53 }
  0xa9   :  { %v592_v54 = vpop.permute.xlu1 %591  ;;  %v587_v55 = vpop.permute.xlu0 %586 }
  0xaa   :  { %v2305_v23 = vadd.f32 %v2186_v24, %v592_v54  ;;  %v2308_v26 = vadd.f32 %v2188_v25, %v592_v54  ;;  %v2311_v27 = vadd.f32 %v2186_v24, %v587_v55  ;;  %v2314_v32 = vadd.f32 %v2188_v25, %v587_v55 }
  0xad   :  { %v602_v56 = vpop.permute.xlu1 %601  ;;  %v597_v57 = vpop.permute.xlu0 %596 }
  0xae   :  { %v2317_v33 = vadd.f32 %v2186_v24, %v602_v56  ;;  %v2320_v38 = vadd.f32 %v2188_v25, %v602_v56  ;;  %v2323_v39 = vadd.f32 %v2186_v24, %v597_v57  ;;  %v2326_v44 = vadd.f32 %v2188_v25, %v597_v57 }
  0xb1   :  { %v612_v58 = vpop.permute.xlu1 %611  ;;  %v607_v59 = vpop.permute.xlu0 %606 }
  0xb2   :  { %v2329_v51 = vadd.f32 %v2186_v24, %v612_v58  ;;  %v2332_v52 = vadd.f32 %v2188_v25, %v612_v58  ;;  %v2335_v56 = vadd.f32 %v2186_v24, %v607_v59  ;;  %v2338_v17 = vadd.f32 %v2188_v25, %v607_v59 }
  0xb5   :  { %v622_v8 = vpop.permute.xlu1 %621  ;;  %v617_v18 = vpop.permute.xlu0 %616 }
  0xb6   :  { %v2341_v57 = vadd.f32 %v2186_v24, %v622_v8  ;;  %v2344_v47 = vadd.f32 %v2188_v25, %v622_v8  ;;  %v2350_v43 = vadd.f32 %v2188_v25, %v617_v18 }
  0xb8   :  { %3250 = vst [vmem:[#allocation17_spill] sm:$0xff] %v2341_v57  ;;  %3251 = vst [vmem:[#allocation18_spill] sm:$0xff] %v2344_v47 }
  0xb9   :  { %v632_v53 = vpop.permute.xlu1 %631  ;;  %v627_v48 = vpop.permute.xlu0 %626  ;;  %3253 = vst [vmem:[#allocation20_spill] sm:$0xff] %v2350_v43 }
  0xba   :  { %v2353_v59 = vadd.f32 %v2186_v24, %v632_v53  ;;  %v2356_v42 = vadd.f32 %v2188_v25, %v632_v53 }
  0xbc   :  { %3254 = vst [vmem:[#allocation21_spill] sm:$0xff] %v2353_v59  ;;  %3255 = vst [vmem:[#allocation22_spill] sm:$0xff] %v2356_v42 }
  0xbd   :  { %v2365_v34 = vpop.permute.xlu1 %641 }
  0xcd   :  { %v260_v45 = vpop.f32.mrf.mxu0  ;;  %v356_v50 = vpop.f32.mrf.mxu1 }
  0xce   :  { %v719_v54 = vmul.f32 2.0, %v260_v45  ;;  %v751_v55 = vmul.f32 2.0, %v356_v50  ;;  %v2347_v50 = vadd.f32 %v2186_v24, %v617_v18 }
  0xcf   :  { %v262_v46 = vpop.f32.mrf.mxu0  ;;  %v358_v49 = vpop.f32.mrf.mxu1 }
  0xd0   :  { %v783_v58 = vsub.f32 %v655_v62, %v719_v54  ;;  %v815_v41 = vsub.f32 %v687_v15, %v751_v55  ;;  %v720_v40 = vmul.f32 2.0, %v262_v46  ;;  %v752_v45 = vmul.f32 2.0, %v358_v49  ;;  %3252 = vst [vmem:[#allocation19_spill] sm:$0xff] %v2347_v50 }
  0xd1   :  { %v266_v8 = vpop.f32.mrf.mxu0  ;;  %v362_v47 = vpop.f32.mrf.mxu1  ;;  %v2360_v49 = vadd.f32 %v2186_v24, %v627_v48  ;;  %v2363_v15 = vadd.f32 %v2188_v25, %v627_v48 }
  0xd2   :  { %v847_v35 = vmax.f32 %v783_v58, 0.0  ;;  %v879_v57 = vmax.f32 %v815_v41, 0.0  ;;  %v784_v62 = vsub.f32 %v2246_v63, %v720_v40  ;;  %v816_v46 = vsub.f32 %v688_v16, %v752_v45 }
  0xd3   :  { %3256 = vst [vmem:[#allocation23_spill] sm:$0xff] %v2360_v49  ;;  %3257 = vst [vmem:[#allocation24_spill] sm:$0xff] %v2363_v15  ;;  %v721_v18 = vmul.f32 2.0, %v266_v8  ;;  %v753_v54 = vmul.f32 2.0, %v362_v47  ;;  %v268_v55 = vpop.f32.mrf.mxu0  ;;  %v364_v59 = vpop.f32.mrf.mxu1 }
  0xd4   :  { %v911_v53 = vsub.f32 0.0, %v847_v35  ;;  %v943_v42 = vsub.f32 0.0, %v879_v57  ;;  %v848_v43 = vmax.f32 %v784_v62, 0.0  ;;  %v880_v58 = vmax.f32 %v816_v46, 0.0 }
  0xd5   :  { %v785_v41 = vsub.f32 %v2255_v2, %v721_v18  ;;  %v817_v40 = vsub.f32 %v2285_v13, %v753_v54  ;;  %v722_v63 = vmul.f32 2.0, %v268_v55  ;;  %v754_v16 = vmul.f32 2.0, %v364_v59  ;;  %v272_v45 = vpop.f32.mrf.mxu0  ;;  %v368_v49 = vpop.f32.mrf.mxu1 }
  0xd6   :  { %v975_v48 = vmul.f32 0.005, %v911_v53  ;;  %v1007_v15 = vmul.f32 0.005, %v943_v42  ;;  %v912_v8 = vsub.f32 0.0, %v848_v43  ;;  %v944_v47 = vsub.f32 0.0, %v880_v58 }
  0xd7   :  { %v849_v37 = vmax.f32 %v785_v41, 0.0  ;;  %v881_v50 = vmax.f32 %v817_v40, 0.0  ;;  %v786_v36 = vsub.f32 %v2258_v3, %v722_v63  ;;  %v818_v35 = vsub.f32 %v2288_v14, %v754_v16  ;;  %v274_v57 = vpop.f32.mrf.mxu0  ;;  %v370_v62 = vpop.f32.mrf.mxu1 }
  0xd8   :  { %v2373_v2 = vadd.f32 %v2186_v24, %v2365_v34  ;;  %v1039_v13 = vmul.f32 1.442695, %v975_v48  ;;  %v1103_v59 = vmul.f32 1.442695, %v1007_v15  ;;  %v976_v46 = vmul.f32 0.005, %v912_v8 }
  0xd9   :  { %v1008_v18 = vmul.f32 0.005, %v944_v47  ;;  %v913_v54 = vsub.f32 0.0, %v849_v37  ;;  %v945_v42 = vsub.f32 0.0, %v881_v50  ;;  %v850_v43 = vmax.f32 %v786_v36, 0.0  ;;  %v278_v55 = vpop.f32.mrf.mxu0  ;;  %v374_v41 = vpop.f32.mrf.mxu1 }
  0xda   :  { %3258 = vst [vmem:[#allocation25_spill] sm:$0xff] %v2373_v2  ;;  %1654 = vpow2.f32 %v1039_v13  ;;  %v1041_v53 = vmul.f32 1.442695, %v976_v46  ;;  %v882_v58 = vmax.f32 %v818_v35, 0.0  ;;  %v723_v3 = vmul.f32 2.0, %v272_v45 }
  0xdb   :  { %1656 = vpow2.f32 %v1103_v59  ;;  %v1105_v14 = vmul.f32 1.442695, %v1008_v18  ;;  %v977_v40 = vmul.f32 0.005, %v913_v54  ;;  %v1009_v63 = vmul.f32 0.005, %v945_v42  ;;  %v280_v48 = vpop.f32.mrf.mxu0  ;;  %v376_v45 = vpop.f32.mrf.mxu1 }
  0xdc   :  { %1658 = vpow2.f32 %v1041_v53  ;;  %v914_v16 = vsub.f32 0.0, %v850_v43  ;;  %v946_v2 = vsub.f32 0.0, %v882_v58  ;;  %v787_v15 = vsub.f32 %v2239_v60, %v723_v3 }
  0xdd   :  { %1660 = vpow2.f32 %v1105_v14  ;;  %v1043_v37 = vmul.f32 1.442695, %v977_v40  ;;  %v1107_v50 = vmul.f32 1.442695, %v1009_v63  ;;  %v755_v36 = vmul.f32 2.0, %v368_v49  ;;  %v284_v60 = vpop.f32.mrf.mxu0  ;;  %v380_v40 = vpop.f32.mrf.mxu1 }
  0xde   :  { %v978_v8 = vmul.f32 0.005, %v914_v16  ;;  %v1010_v47 = vmul.f32 0.005, %v946_v2  ;;  %v851_v13 = vmax.f32 %v787_v15, 0.0  ;;  %v724_v35 = vmul.f32 2.0, %v274_v57 }
  0xdf   :  { %1662 = vpow2.f32 %v1043_v37  ;;  %v819_v59 = vsub.f32 %v2299_v21, %v755_v36  ;;  %v756_v46 = vmul.f32 2.0, %v370_v62  ;;  %v725_v18 = vmul.f32 2.0, %v278_v55 }
  0xe0   :  { %1664 = vpow2.f32 %v1107_v50  ;;  %v1045_v54 = vmul.f32 1.442695, %v978_v8  ;;  %v1109_v42 = vmul.f32 1.442695, %v1010_v47  ;;  %v915_v43 = vsub.f32 0.0, %v851_v13  ;;  %v382_v47 = vpop.f32.mrf.mxu1 }
  0xe1   :  { %v883_v53 = vmax.f32 %v819_v59, 0.0  ;;  %v788_v58 = vsub.f32 %v2242_v61, %v724_v35  ;;  %v820_v49 = vsub.f32 %v2302_v22, %v756_v46  ;;  %v789_v2 = vsub.f32 %v2249_v0, %v725_v18  ;;  %v286_v61 = vpop.f32.mrf.mxu0 }
  0xe2   :  { %1666 = vpow2.f32 %v1045_v54  ;;  %v979_v57 = vmul.f32 0.005, %v915_v43  ;;  %v757_v3 = vmul.f32 2.0, %v374_v41  ;;  %v726_v14 = vmul.f32 2.0, %v280_v48 }
  0xe3   :  { %1668 = vpow2.f32 %v1109_v42  ;;  %v947_v21 = vsub.f32 0.0, %v883_v53  ;;  %v852_v62 = vmax.f32 %v788_v58, 0.0  ;;  %v884_v55 = vmax.f32 %v820_v49, 0.0  ;;  %v290_v53 = vpop.f32.mrf.mxu0 }
  0xe4   :  { %v1047_v63 = vmul.f32 1.442695, %v979_v57  ;;  %v853_v16 = vmax.f32 %v789_v2, 0.0  ;;  %v821_v15 = vsub.f32 %v2293_v19, %v757_v3  ;;  %v790_v37 = vsub.f32 %v2252_v1, %v726_v14 }
  0xe5   :  { %v1011_v50 = vmul.f32 0.005, %v947_v21  ;;  %v916_v22 = vsub.f32 0.0, %v852_v62  ;;  %v948_v36 = vsub.f32 0.0, %v884_v55  ;;  %v758_v0 = vmul.f32 2.0, %v376_v45  ;;  %v386_v62 = vpop.f32.mrf.mxu1 }
  0xe6   :  { %1670 = vpow2.f32 %v1047_v63  ;;  %v917_v8 = vsub.f32 0.0, %v853_v16  ;;  %v885_v41 = vmax.f32 %v821_v15, 0.0  ;;  %v854_v48 = vmax.f32 %v790_v37, 0.0 }
  0xe7   :  { %v2382_v13 = vpop.eup %1654  ;;  %v1111_v35 = vmul.f32 1.442695, %v1011_v50  ;;  %v980_v59 = vmul.f32 0.005, %v916_v22  ;;  %v1012_v46 = vmul.f32 0.005, %v948_v36  ;;  %v822_v18 = vsub.f32 %v2296_v20, %v758_v0  ;;  %v292_v22 = vpop.f32.mrf.mxu0 }
  0xe8   :  { %v2385_v19 = vpop.eup %1656  ;;  %v981_v1 = vmul.f32 0.005, %v917_v8  ;;  %v949_v54 = vsub.f32 0.0, %v885_v41  ;;  %v918_v42 = vsub.f32 0.0, %v854_v48  ;;  %v727_v43 = vmul.f32 2.0, %v284_v60 }
  0xe9   :  { %v2387_v45 = vpop.eup %1658  ;;  %1672 = vpow2.f32 %v1111_v35  ;;  %v1049_v58 = vmul.f32 1.442695, %v980_v59  ;;  %v1113_v49 = vmul.f32 1.442695, %v1012_v46  ;;  %v886_v2 = vmax.f32 %v822_v18, 0.0  ;;  %v388_v35 = vpop.f32.mrf.mxu1 }
  0xea   :  { %v2389_v57 = vpop.eup %1660  ;;  %v1051_v3 = vmul.f32 1.442695, %v981_v1  ;;  %v1013_v14 = vmul.f32 0.005, %v949_v54  ;;  %v982_v21 = vmul.f32 0.005, %v918_v42  ;;  %v791_v20 = vsub.f32 %v2267_v6, %v727_v43 }
  0xeb   :  { %1674 = vpow2.f32 %v1049_v58  ;;  %v950_v55 = vsub.f32 0.0, %v886_v2  ;;  %v759_v63 = vmul.f32 2.0, %v380_v40  ;;  %v728_v16 = vmul.f32 2.0, %v286_v61 }
  0xec   :  { %v2392_v60 = vpop.eup %1662  ;;  %v2396_v15 = vadd.f32 %v2188_v25, %v2365_v34  ;;  %1676 = vpow2.f32 %v1113_v49  ;;  %v1115_v37 = vmul.f32 1.442695, %v1013_v14  ;;  %v855_v50 = vmax.f32 %v791_v20, 0.0 }
  0xed   :  { %v2398_v36 = vpop.eup %1664  ;;  %v1053_v0 = vmul.f32 1.442695, %v982_v21  ;;  %v1014_v8 = vmul.f32 0.005, %v950_v55  ;;  %v823_v6 = vsub.f32 %v2311_v27, %v759_v63  ;;  %v792_v41 = vsub.f32 %v2270_v7, %v728_v16  ;;  %v296_v7 = vpop.f32.mrf.mxu0 }
  0xee   :  { %1678 = vpow2.f32 %v1051_v3  ;;  %v919_v40 = vsub.f32 0.0, %v855_v50  ;;  %v760_v61 = vmul.f32 2.0, %v382_v47  ;;  %v729_v48 = vmul.f32 2.0, %v290_v53  ;;  %v392_v21 = vpop.f32.mrf.mxu1 }
  0xef   :  { %v2402_v59 = vpop.eup %1666  ;;  %1680 = vpow2.f32 %v1115_v37  ;;  %v1117_v34 = vmul.f32 1.442695, %v1014_v8  ;;  %v887_v46 = vmax.f32 %v823_v6, 0.0  ;;  %v856_v18 = vmax.f32 %v792_v41, 0.0  ;;  %v298_v50 = vpop.f32.mrf.mxu0 }
  0xf0   :  { %v2404_v1 = vpop.eup %1668  ;;  %v983_v54 = vmul.f32 0.005, %v919_v40  ;;  %v824_v42 = vsub.f32 %v2314_v32, %v760_v61  ;;  %v793_v27 = vsub.f32 %v2261_v4, %v729_v48  ;;  %v761_v43 = vmul.f32 2.0, %v386_v62 }
  0xf1   :  { %1682 = vpow2.f32 %v1053_v0  ;;  %v951_v58 = vsub.f32 0.0, %v887_v46  ;;  %v920_v47 = vsub.f32 0.0, %v856_v18  ;;  %v730_v53 = vmul.f32 2.0, %v292_v22  ;;  %v394_v46 = vpop.f32.mrf.mxu1 }
  0xf2   :  { %v1055_v49 = vmul.f32 1.442695, %v983_v54  ;;  %v888_v2 = vmax.f32 %v824_v42, 0.0  ;;  %v857_v3 = vmax.f32 %v793_v27, 0.0  ;;  %v825_v14 = vsub.f32 %v2305_v23, %v761_v43  ;;  %v2417_v54 = vpop.permute.xlu0 %636 }
  0xf3   :  { %v2409_v20 = vpop.eup %1670  ;;  %v1015_v55 = vmul.f32 0.005, %v951_v58  ;;  %v984_v63 = vmul.f32 0.005, %v920_v47  ;;  %v794_v32 = vsub.f32 %v2264_v5, %v730_v53  ;;  %v762_v16 = vmul.f32 2.0, %v388_v35 }
  0xf4   :  { %1684 = vpow2.f32 %v1117_v34  ;;  %v952_v4 = vsub.f32 0.0, %v888_v2  ;;  %v921_v62 = vsub.f32 0.0, %v857_v3  ;;  %v889_v37 = vmax.f32 %v825_v14, 0.0 }
  0xf5   :  { %v1119_v0 = vmul.f32 1.442695, %v1015_v55  ;;  %v1057_v22 = vmul.f32 1.442695, %v984_v63  ;;  %v858_v8 = vmax.f32 %v794_v32, 0.0  ;;  %v826_v6 = vsub.f32 %v2308_v26, %v762_v16  ;;  %v302_v26 = vpop.f32.mrf.mxu0 }
  0xf6   :  { %v2413_v41 = vpop.eup %1672  ;;  %v1016_v23 = vmul.f32 0.005, %v952_v4  ;;  %v985_v40 = vmul.f32 0.005, %v921_v62  ;;  %v953_v61 = vsub.f32 0.0, %v889_v37  ;;  %v731_v48 = vmul.f32 2.0, %v296_v7 }
  0xf7   :  { %1686 = vpow2.f32 %v1055_v49  ;;  %v922_v5 = vsub.f32 0.0, %v858_v8  ;;  %v890_v35 = vmax.f32 %v826_v6, 0.0  ;;  %v763_v34 = vmul.f32 2.0, %v392_v21  ;;  %v398_v21 = vpop.f32.mrf.mxu1  ;;  %v304_v37 = vpop.f32.mrf.mxu0 }
  0xf8   :  { %v2415_v18 = vpop.eup %1674  ;;  %1688 = vpow2.f32 %v1119_v0  ;;  %v1121_v42 = vmul.f32 1.442695, %v1016_v23  ;;  %v1059_v27 = vmul.f32 1.442695, %v985_v40  ;;  %v1017_v43 = vmul.f32 0.005, %v953_v61 }
  0xf9   :  { %v2419_v58 = vpop.eup %1676  ;;  %v986_v47 = vmul.f32 0.005, %v922_v5  ;;  %v954_v53 = vsub.f32 0.0, %v890_v35  ;;  %v795_v7 = vsub.f32 %v2279_v11, %v731_v48  ;;  %v827_v49 = vsub.f32 %v2323_v39, %v763_v34  ;;  %v400_v61 = vpop.f32.mrf.mxu1 }
  0xfa   :  { %1690 = vpow2.f32 %v1057_v22  ;;  %v1123_v2 = vmul.f32 1.442695, %v1017_v43  ;;  %v732_v3 = vmul.f32 2.0, %v298_v50  ;;  %v764_v14 = vmul.f32 2.0, %v394_v46 }
  0xfb   :  { %v2423_v55 = vpop.eup %1678  ;;  %v2427_v63 = vadd.f32 %v2186_v24, %v2417_v54  ;;  %1692 = vpow2.f32 %v1121_v42  ;;  %v1018_v32 = vmul.f32 0.005, %v954_v53  ;;  %v859_v16 = vmax.f32 %v795_v7, 0.0 }
  0xfc   :  { %v2429_v4 = vpop.eup %1680  ;;  %1694 = vpow2.f32 %v1059_v27  ;;  %v891_v11 = vmax.f32 %v827_v49, 0.0  ;;  %v796_v39 = vsub.f32 %v2282_v12, %v732_v3  ;;  %v828_v62 = vsub.f32 %v2326_v44, %v764_v14  ;;  %v308_v3 = vpop.f32.mrf.mxu0 }
  0xfd   :  { %1696 = vpow2.f32 %v1123_v2  ;;  %v1061_v50 = vmul.f32 1.442695, %v986_v47  ;;  %v923_v0 = vsub.f32 0.0, %v859_v16  ;;  %v733_v22 = vmul.f32 2.0, %v302_v26 }
  0xfe   :  { %v2433_v8 = vpop.eup %1682  ;;  %v955_v24 = vsub.f32 0.0, %v891_v11  ;;  %v860_v6 = vmax.f32 %v796_v39, 0.0  ;;  %v892_v23 = vmax.f32 %v828_v62, 0.0  ;;  %v765_v40 = vmul.f32 2.0, %v398_v21 }
  0xff   :  { %v1125_v48 = vmul.f32 1.442695, %v1018_v32  ;;  %v987_v46 = vmul.f32 0.005, %v923_v0  ;;  %v797_v5 = vsub.f32 %v2273_v9, %v733_v22  ;;  %v734_v35 = vmul.f32 2.0, %v304_v37  ;;  %v404_v32 = vpop.f32.mrf.mxu1 }
 0x100   :  { %v1019_v12 = vmul.f32 0.005, %v955_v24  ;;  %v924_v34 = vsub.f32 0.0, %v860_v6  ;;  %v956_v44 = vsub.f32 0.0, %v892_v23  ;;  %v829_v42 = vsub.f32 %v2317_v33, %v765_v40  ;;  %v310_v23 = vpop.f32.mrf.mxu0 }
 0x101   :  { %v2437_v27 = vpop.eup %1684  ;;  %v1063_v43 = vmul.f32 1.442695, %v987_v46  ;;  %v861_v26 = vmax.f32 %v797_v5, 0.0  ;;  %v798_v47 = vsub.f32 %v2276_v10, %v734_v35  ;;  %v766_v53 = vmul.f32 2.0, %v400_v61  ;;  %v406_v5 = vpop.f32.mrf.mxu1 }
 0x102   :  { %1698 = vpow2.f32 %v1061_v50  ;;  %v1127_v7 = vmul.f32 1.442695, %v1019_v12  ;;  %v988_v49 = vmul.f32 0.005, %v924_v34  ;;  %v1020_v2 = vmul.f32 0.005, %v956_v44 }
 0x103   :  { %1700 = vpow2.f32 %v1125_v48  ;;  %v925_v9 = vsub.f32 0.0, %v861_v26  ;;  %v893_v14 = vmax.f32 %v829_v42, 0.0  ;;  %v862_v21 = vmax.f32 %v798_v47, 0.0 }
 0x104   :  { %v2440_v16 = vpop.eup %1686  ;;  %1702 = vpow2.f32 %v1063_v43  ;;  %v1065_v33 = vmul.f32 1.442695, %v988_v49  ;;  %v1129_v11 = vmul.f32 1.442695, %v1020_v2  ;;  %v830_v39 = vsub.f32 %v2320_v38, %v766_v53 }
 0x105   :  { %v2443_v62 = vpop.eup %1688  ;;  %v989_v10 = vmul.f32 0.005, %v925_v9  ;;  %v957_v37 = vsub.f32 0.0, %v893_v14  ;;  %v926_v50 = vsub.f32 0.0, %v862_v21  ;;  %v735_v0 = vmul.f32 2.0, %v308_v3  ;;  %v410_v9 = vpop.f32.mrf.mxu1 }
 0x106   :  { %1704 = vpow2.f32 %v1127_v7  ;;  %v894_v22 = vmax.f32 %v830_v39, 0.0  ;;  %v767_v24 = vmul.f32 2.0, %v404_v32  ;;  %v1199_v6 = vmul.f32 0.039894227, %v2385_v19 }
 0x107   :  { %v2446_v40 = vpop.eup %1690  ;;  %1706 = vpow2.f32 %v1065_v33  ;;  %v1067_v61 = vmul.f32 1.442695, %v989_v10  ;;  %v1021_v48 = vmul.f32 0.005, %v957_v37  ;;  %v990_v46 = vmul.f32 0.005, %v926_v50 }
 0x108   :  { %v2448_v38 = vpop.eup %1692  ;;  %v958_v35 = vsub.f32 0.0, %v894_v22  ;;  %v799_v12 = vsub.f32 %v2197_v30, %v735_v0  ;;  %v831_v34 = vsub.f32 %v2335_v56, %v767_v24  ;;  %v1200_v44 = vmul.f32 0.039894227, %v2389_v57  ;;  %1263 = vst [vmem:[#allocation2 + $0x100] sm:$0xff] %v1199_v6  ;;  %v314_v30 = vpop.f32.mrf.mxu0 }
 0x109   :  { %v2453_v42 = vpop.eup %1694  ;;  %1708 = vpow2.f32 %v1129_v11  ;;  %v1131_v19 = vmul.f32 1.442695, %v1021_v48  ;;  %v1069_v43 = vmul.f32 1.442695, %v990_v46  ;;  %v1167_v26 = vmul.f32 0.039894227, %v2382_v13 }
 0x10a   :  { %v2456_v47 = vpop.eup %1696  ;;  %v1022_v53 = vmul.f32 0.005, %v958_v35  ;;  %v863_v7 = vmax.f32 %v799_v12, 0.0  ;;  %v895_v49 = vmax.f32 %v831_v34, 0.0  ;;  %v1375_v2 = vadd.f32 %v1200_v44, %v1199_v6  ;;  %1264 = vst [vmem:[#allocation2 + $0x108] sm:$0xff] %v1200_v44  ;;  %v316_v50 = vpop.f32.mrf.mxu0 }
 0x10b   :  { %1710 = vpow2.f32 %v1067_v61  ;;  %v1168_v56 = vmul.f32 0.039894227, %v2387_v45  ;;  %1231 = vst [vmem:[#allocation2] sm:$0xff] %v1167_v26  ;;  %v736_v57 = vmul.f32 2.0, %v310_v23  ;;  %v768_v3 = vmul.f32 2.0, %v406_v5  ;;  %v412_v5 = vpop.f32.mrf.mxu1 }
 0x10c   :  { %1712 = vpow2.f32 %v1131_v19  ;;  %v1133_v14 = vmul.f32 1.442695, %v1022_v53  ;;  %v927_v21 = vsub.f32 0.0, %v863_v7  ;;  %v959_v32 = vsub.f32 0.0, %v895_v49  ;;  %1376 = vadd.xlane.f32.xlu1 %v1375_v2 }
 0x10d   :  { %v1327_v13 = vadd.f32 %v1168_v56, %v1167_v26  ;;  %1232 = vst [vmem:[#allocation2 + $0x8] sm:$0xff] %v1168_v56  ;;  %v800_v33 = vsub.f32 %v2200_v31, %v736_v57  ;;  %v832_v11 = vsub.f32 %v2338_v17, %v768_v3  ;;  %v737_v39 = vmul.f32 2.0, %v314_v30  ;;  %v320_v26 = vpop.f32.mrf.mxu0  ;;  %v416_v57 = vpop.f32.mrf.mxu1 }
 0x10e   :  { %1714 = vpow2.f32 %v1069_v43  ;;  %v991_v10 = vmul.f32 0.005, %v927_v21  ;;  %v1023_v37 = vmul.f32 0.005, %v959_v32  ;;  %v769_v45 = vmul.f32 2.0, %v410_v9 }
 0x10f   :  { %v2461_v0 = vpop.eup %1698  ;;  %1328 = vadd.xlane.f32.xlu0 %v1327_v13  ;;  %v864_v22 = vmax.f32 %v800_v33, 0.0  ;;  %v896_v24 = vmax.f32 %v832_v11, 0.0  ;;  %v801_v6 = vsub.f32 %v2191_v28, %v737_v39  ;;  %v1201_v23 = vmul.f32 0.039894227, %v2398_v36  ;;  %v322_v11 = vpop.f32.mrf.mxu0 }
 0x110   :  { %v2465_v61 = vpop.eup %1700  ;;  %v1071_v31 = vmul.f32 1.442695, %v991_v10  ;;  %v1135_v48 = vmul.f32 1.442695, %v1023_v37  ;;  %v833_v17 = vsub.f32 %v2329_v51, %v769_v45  ;;  %v1202_v46 = vmul.f32 0.039894227, %v2404_v1 }
 0x111   :  { %v2469_v35 = vpop.eup %1702  ;;  %v928_v12 = vsub.f32 0.0, %v864_v22  ;;  %v960_v34 = vsub.f32 0.0, %v896_v24  ;;  %v865_v44 = vmax.f32 %v801_v6, 0.0  ;;  %1265 = vst [vmem:[#allocation2 + $0x110] sm:$0xff] %v1201_v23  ;;  %v1169_v19 = vmul.f32 0.039894227, %v2392_v60  ;;  %v418_v6 = vpop.f32.mrf.mxu1 }
 0x112   :  { %1716 = vpow2.f32 %v1133_v14  ;;  %v897_v28 = vmax.f32 %v833_v17, 0.0  ;;  %1266 = vst [vmem:[#allocation2 + $0x118] sm:$0xff] %v1202_v46  ;;  %v1378_v36 = vadd.f32 %v1202_v46, %v1201_v23  ;;  %v1170_v43 = vmul.f32 0.039894227, %v2402_v59 }
 0x113   :  { %v2473_v53 = vpop.eup %1704  ;;  %1718 = vpow2.f32 %v1071_v31  ;;  %v992_v51 = vmul.f32 0.005, %v928_v12  ;;  %v1024_v1 = vmul.f32 0.005, %v960_v34  ;;  %v929_v7 = vsub.f32 0.0, %v865_v44  ;;  %1233 = vst [vmem:[#allocation2 + $0x10] sm:$0xff] %v1169_v19  ;;  %v326_v12 = vpop.f32.mrf.mxu0 }
 0x114   :  { %v2475_v49 = vpop.eup %1706  ;;  %v961_v2 = vsub.f32 0.0, %v897_v28  ;;  %1379 = vadd.xlane.f32.xlu0 %v1378_v36  ;;  %v1330_v30 = vadd.f32 %v1170_v43, %v1169_v19  ;;  %1234 = vst [vmem:[#allocation2 + $0x18] sm:$0xff] %v1170_v43  ;;  %v738_v60 = vmul.f32 2.0, %v316_v50  ;;  %v770_v56 = vmul.f32 2.0, %v412_v5 }
 0x115   :  { %1720 = vpow2.f32 %v1135_v48  ;;  %v1073_v3 = vmul.f32 1.442695, %v992_v51  ;;  %v1137_v59 = vmul.f32 1.442695, %v1024_v1  ;;  %v993_v9 = vmul.f32 0.005, %v929_v7  ;;  %v422_v1 = vpop.f32.mrf.mxu1 }
 0x116   :  { %v2477_v14 = vpop.eup %1708  ;;  %v1025_v21 = vmul.f32 0.005, %v961_v2  ;;  %1331 = vadd.xlane.f32.xlu1 %v1330_v30  ;;  %v802_v32 = vsub.f32 %v2194_v29, %v738_v60  ;;  %v834_v13 = vsub.f32 %v2332_v52, %v770_v56  ;;  %v739_v33 = vmul.f32 2.0, %v320_v26  ;;  %v3259_v29 = vld [vmem:[#allocation7_spill] sm:$0xff] }
 0x117   :  { %1722 = vpow2.f32 %v1073_v3  ;;  %v1075_v39 = vmul.f32 1.442695, %v993_v9  ;;  %v771_v10 = vmul.f32 2.0, %v416_v57  ;;  %v1203_v37 = vmul.f32 0.039894227, %v2413_v41  ;;  %v3260_v52 = vld [vmem:[#allocation19_spill] sm:$0xff] }
 0x118   :  { %v2482_v45 = vpop.eup %1710  ;;  %1724 = vpow2.f32 %v1137_v59  ;;  %v1139_v50 = vmul.f32 1.442695, %v1025_v21  ;;  %v866_v22 = vmax.f32 %v802_v32, 0.0  ;;  %v898_v24 = vmax.f32 %v834_v13, 0.0  ;;  %v3261_v57 = vld [vmem:[#allocation8_spill] sm:$0xff]  ;;  %v3263_v13 = vld [vmem:[#allocation5_spill] sm:$0xff] }
 0x119   :  { %v2484_v23 = vpop.eup %1712  ;;  %1726 = vpow2.f32 %v1075_v39  ;;  %v803_v31 = vsub.f32 %v3259_v29, %v739_v33  ;;  %v835_v48 = vsub.f32 %v3260_v52, %v771_v10  ;;  %v1204_v17 = vmul.f32 0.039894227, %v2419_v58  ;;  %1267 = vst [vmem:[#allocation2 + $0x120] sm:$0xff] %v1203_v37  ;;  %v3262_v59 = vld [vmem:[#allocation20_spill] sm:$0xff]  ;;  %v328_v39 = vpop.f32.mrf.mxu0 }
 0x11a   :  { %1728 = vpow2.f32 %v1139_v50  ;;  %v930_v46 = vsub.f32 0.0, %v866_v22  ;;  %v962_v41 = vsub.f32 0.0, %v898_v24  ;;  %v1171_v5 = vmul.f32 0.039894227, %v2409_v20  ;;  %v424_v24 = vpop.f32.mrf.mxu1 }
 0x11b   :  { %v2490_v34 = vpop.eup %1714  ;;  %v867_v44 = vmax.f32 %v803_v31, 0.0  ;;  %v899_v19 = vmax.f32 %v835_v48, 0.0  ;;  %1268 = vst [vmem:[#allocation2 + $0x128] sm:$0xff] %v1204_v17  ;;  %v1381_v28 = vadd.f32 %v1204_v17, %v1203_v37  ;;  %v1172_v36 = vmul.f32 0.039894227, %v2415_v18 }
 0x11c   :  { %v994_v43 = vmul.f32 0.005, %v930_v46  ;;  %v1026_v26 = vmul.f32 0.005, %v962_v41  ;;  %1235 = vst [vmem:[#allocation2 + $0x20] sm:$0xff] %v1171_v5  ;;  %v740_v51 = vmul.f32 2.0, %v322_v11 }
 0x11d   :  { %v772_v58 = vmul.f32 2.0, %v418_v6  ;;  %v931_v7 = vsub.f32 0.0, %v867_v44  ;;  %v963_v2 = vsub.f32 0.0, %v899_v19  ;;  %1382 = vadd.xlane.f32.xlu1 %v1381_v28  ;;  %v1333_v30 = vadd.f32 %v1172_v36, %v1171_v5  ;;  %1236 = vst [vmem:[#allocation2 + $0x28] sm:$0xff] %v1172_v36  ;;  %v3264_v46 = vld [vmem:[#allocation17_spill] sm:$0xff]  ;;  %v332_v28 = vpop.f32.mrf.mxu0 }
 0x11e   :  { %v741_v20 = vmul.f32 2.0, %v326_v12  ;;  %v1077_v60 = vmul.f32 1.442695, %v994_v43  ;;  %v1141_v56 = vmul.f32 1.442695, %v1026_v26  ;;  %v804_v3 = vsub.f32 %v3261_v57, %v740_v51  ;;  %v428_v26 = vpop.f32.mrf.mxu1 }
 0x11f   :  { %v836_v9 = vsub.f32 %v3262_v59, %v772_v58  ;;  %v2495_v21 = vpop.eup %1716  ;;  %v995_v18 = vmul.f32 0.005, %v931_v7  ;;  %v1027_v32 = vmul.f32 0.005, %v963_v2  ;;  %1334 = vadd.xlane.f32.xlu0 %v1333_v30  ;;  %v773_v11 = vmul.f32 2.0, %v422_v1  ;;  %v3265_v7 = vld [vmem:[#allocation6_spill] sm:$0xff] }
 0x120   :  { %v805_v33 = vsub.f32 %v3263_v13, %v741_v20  ;;  %v2498_v10 = vpop.eup %1718  ;;  %1730 = vpow2.f32 %v1077_v60  ;;  %v868_v37 = vmax.f32 %v804_v3, 0.0  ;;  %v1173_v22 = vmul.f32 0.039894227, %v2423_v55  ;;  %v3266_v2 = vld [vmem:[#allocation18_spill] sm:$0xff]  ;;  %v334_v13 = vpop.f32.mrf.mxu0 }
 0x121   :  { %v900_v50 = vmax.f32 %v836_v9, 0.0  ;;  %v2503_v6 = vadd.f32 %v2188_v25, %v2417_v54  ;;  %1732 = vpow2.f32 %v1141_v56  ;;  %v1079_v29 = vmul.f32 1.442695, %v995_v18 }
 0x122   :  { %v869_v31 = vmax.f32 %v805_v33, 0.0  ;;  %v2505_v52 = vpop.eup %1720  ;;  %v932_v48 = vsub.f32 0.0, %v868_v37  ;;  %v837_v41 = vsub.f32 %v3264_v46, %v773_v11  ;;  %v1174_v5 = vmul.f32 0.039894227, %v2433_v8  ;;  %1237 = vst [vmem:[#allocation2 + $0x30] sm:$0xff] %v1173_v22 }
 0x123   :  { %v964_v17 = vsub.f32 0.0, %v900_v50  ;;  %v1143_v12 = vmul.f32 1.442695, %v1027_v32  ;;  %v742_v55 = vmul.f32 2.0, %v328_v39  ;;  %v774_v19 = vmul.f32 2.0, %v424_v24  ;;  %v3267_v39 = vld [vmem:[#allocation11_spill] sm:$0xff] }
 0x124   :  { %v933_v44 = vsub.f32 0.0, %v869_v31  ;;  %v2509_v36 = vpop.eup %1722  ;;  %1734 = vpow2.f32 %v1079_v29  ;;  %v996_v25 = vmul.f32 0.005, %v932_v48  ;;  %v901_v43 = vmax.f32 %v837_v41, 0.0  ;;  %1238 = vst [vmem:[#allocation2 + $0x38] sm:$0xff] %v1174_v5  ;;  %v3268_v31 = vld [vmem:[#allocation23_spill] sm:$0xff] }
 0x125   :  { %v1028_v54 = vmul.f32 0.005, %v964_v17  ;;  %v2511_v51 = vpop.eup %1724  ;;  %v1336_v1 = vadd.f32 %v1174_v5, %v1173_v22  ;;  %v806_v8 = vsub.f32 %v3265_v7, %v742_v55  ;;  %v838_v30 = vsub.f32 %v3266_v2, %v774_v19  ;;  %v430_v22 = vpop.f32.mrf.mxu1  ;;  %v3269_v7 = vld [vmem:[#allocation12_spill] sm:$0xff] }
 0x126   :  { %v997_v58 = vmul.f32 0.005, %v933_v44  ;;  %v2515_v20 = vpop.eup %1726  ;;  %v1081_v60 = vmul.f32 1.442695, %v996_v25  ;;  %v965_v57 = vsub.f32 0.0, %v901_v43  ;;  %v743_v3 = vmul.f32 2.0, %v332_v28  ;;  %v338_v19 = vpop.f32.mrf.mxu0 }
 0x127   :  { %v1145_v56 = vmul.f32 1.442695, %v1028_v54  ;;  %v2517_v59 = vpop.eup %1728  ;;  %1736 = vpow2.f32 %v1143_v12  ;;  %1337 = vadd.xlane.f32.xlu0 %v1336_v1  ;;  %v870_v9 = vmax.f32 %v806_v8, 0.0  ;;  %v902_v18 = vmax.f32 %v838_v30, 0.0  ;;  %v434_v54 = vpop.f32.mrf.mxu1 }
 0x128   :  { %v775_v32 = vmul.f32 2.0, %v428_v26  ;;  %v1083_v33 = vmul.f32 1.442695, %v997_v58  ;;  %v1029_v11 = vmul.f32 0.005, %v965_v57  ;;  %v807_v37 = vsub.f32 %v3267_v39, %v743_v3 }
 0x129   :  { %v1205_v50 = vmul.f32 0.039894227, %v2429_v4  ;;  %1738 = vpow2.f32 %v1081_v60  ;;  %v934_v24 = vsub.f32 0.0, %v870_v9  ;;  %v966_v29 = vsub.f32 0.0, %v902_v18  ;;  %v340_v9 = vpop.f32.mrf.mxu0 }
 0x12a   :  { %v839_v48 = vsub.f32 %v3268_v31, %v775_v32  ;;  %1740 = vpow2.f32 %v1145_v56  ;;  %v1147_v17 = vmul.f32 1.442695, %v1029_v11  ;;  %v871_v46 = vmax.f32 %v807_v37, 0.0 }
 0x12b   :  { %v1206_v41 = vmul.f32 0.039894227, %v2437_v27  ;;  %1269 = vst [vmem:[#allocation2 + $0x130] sm:$0xff] %v1205_v50  ;;  %v998_v5 = vmul.f32 0.005, %v934_v24  ;;  %v744_v55 = vmul.f32 2.0, %v334_v13  ;;  %1742 = vpow2.f32 %v1083_v33 }
 0x12c   :  { %v1030_v12 = vmul.f32 0.005, %v966_v29  ;;  %v903_v44 = vmax.f32 %v839_v48, 0.0  ;;  %v935_v28 = vsub.f32 0.0, %v871_v46  ;;  %v1175_v25 = vmul.f32 0.039894227, %v2440_v16  ;;  %v436_v29 = vpop.f32.mrf.mxu1 }
 0x12d   :  { %1270 = vst [vmem:[#allocation2 + $0x138] sm:$0xff] %v1206_v41  ;;  %v1384_v4 = vadd.f32 %v1206_v41, %v1205_v50  ;;  %v2524_v43 = vpop.eup %1730  ;;  %v1085_v26 = vmul.f32 1.442695, %v998_v5  ;;  %v808_v27 = vsub.f32 %v3269_v7, %v744_v55  ;;  %v1176_v30 = vmul.f32 0.039894227, %v2446_v40  ;;  %v3270_v13 = vld [vmem:[#allocation24_spill] sm:$0xff] }
 0x12e   :  { %v1149_v58 = vmul.f32 1.442695, %v1030_v12  ;;  %v967_v1 = vsub.f32 0.0, %v903_v44  ;;  %v2527_v8 = vpop.eup %1732  ;;  %v999_v2 = vmul.f32 0.005, %v935_v28  ;;  %1239 = vst [vmem:[#allocation2 + $0x40] sm:$0xff] %v1175_v25  ;;  %1744 = vpow2.f32 %v1147_v17  ;;  %v344_v12 = vpop.f32.mrf.mxu0 }
 0x12f   :  { %1385 = vadd.xlane.f32.xlu0 %v1384_v4  ;;  %v776_v60 = vmul.f32 2.0, %v430_v22  ;;  %v745_v56 = vmul.f32 2.0, %v338_v19  ;;  %v872_v16 = vmax.f32 %v808_v27, 0.0  ;;  %v777_v3 = vmul.f32 2.0, %v434_v54  ;;  %1240 = vst [vmem:[#allocation2 + $0x48] sm:$0xff] %v1176_v30  ;;  %v3271_v50 = vld [vmem:[#allocation9_spill] sm:$0xff] }
 0x130   :  { %v1031_v57 = vmul.f32 0.005, %v967_v1  ;;  %1746 = vpow2.f32 %v1085_v26  ;;  %v1087_v18 = vmul.f32 1.442695, %v999_v2  ;;  %v1339_v32 = vadd.f32 %v1176_v30, %v1175_v25  ;;  %v3272_v24 = vld [vmem:[#allocation21_spill] sm:$0xff] }
 0x131   :  { %v840_v33 = vsub.f32 %v3270_v13, %v776_v60  ;;  %v2531_v11 = vpop.eup %1734  ;;  %v936_v37 = vsub.f32 0.0, %v872_v16  ;;  %v809_v40 = vsub.f32 %v3271_v50, %v745_v56  ;;  %v841_v22 = vsub.f32 %v3272_v24, %v777_v3  ;;  %v3274_v3 = vld [vmem:[#allocation22_spill] sm:$0xff] }
 0x132   :  { %v1151_v39 = vmul.f32 1.442695, %v1031_v57  ;;  %1748 = vpow2.f32 %v1149_v58  ;;  %1340 = vadd.xlane.f32.xlu1 %v1339_v32  ;;  %v1207_v48 = vmul.f32 0.039894227, %v2443_v62  ;;  %v1208_v17 = vmul.f32 0.039894227, %v2448_v38  ;;  %v440_v38 = vpop.f32.mrf.mxu1  ;;  %v346_v57 = vpop.f32.mrf.mxu0 }
 0x133   :  { %v904_v31 = vmax.f32 %v840_v33, 0.0  ;;  %1750 = vpow2.f32 %v1087_v18  ;;  %v1000_v46 = vmul.f32 0.005, %v936_v37  ;;  %v873_v41 = vmax.f32 %v809_v40, 0.0  ;;  %v3275_v18 = vld [vmem:[#allocation15_spill] sm:$0xff] }
 0x134   :  { %v905_v5 = vmax.f32 %v841_v22, 0.0  ;;  %v2537_v44 = vpop.eup %1736  ;;  %1271 = vst [vmem:[#allocation2 + $0x140] sm:$0xff] %v1207_v48  ;;  %1272 = vst [vmem:[#allocation2 + $0x148] sm:$0xff] %v1208_v17  ;;  %v1387_v19 = vadd.f32 %v1208_v17, %v1207_v48  ;;  %v1177_v28 = vmul.f32 0.039894227, %v2453_v42  ;;  %v746_v26 = vmul.f32 2.0, %v340_v9 }
 0x135   :  { %v968_v55 = vsub.f32 0.0, %v904_v31  ;;  %v1178_v4 = vmul.f32 0.039894227, %v2461_v0  ;;  %v1089_v25 = vmul.f32 1.442695, %v1000_v46  ;;  %v937_v54 = vsub.f32 0.0, %v873_v41  ;;  %v442_v46 = vpop.f32.mrf.mxu1 }
 0x136   :  { %v969_v62 = vsub.f32 0.0, %v905_v5  ;;  %v2541_v58 = vpop.eup %1738  ;;  %1388 = vadd.xlane.f32.xlu1 %v1387_v19  ;;  %1241 = vst [vmem:[#allocation2 + $0x50] sm:$0xff] %v1177_v28  ;;  %v778_v27 = vmul.f32 2.0, %v436_v29  ;;  %v747_v2 = vmul.f32 2.0, %v344_v12  ;;  %1752 = vpow2.f32 %v1151_v39  ;;  %v3273_v0 = vld [vmem:[#allocation10_spill] sm:$0xff]  ;;  %v350_v19 = vpop.f32.mrf.mxu0 }
 0x137   :  { %v1032_v1 = vmul.f32 0.005, %v968_v55  ;;  %v1342_v7 = vadd.f32 %v1178_v4, %v1177_v28  ;;  %1242 = vst [vmem:[#allocation2 + $0x58] sm:$0xff] %v1178_v4  ;;  %v2543_v30 = vpop.eup %1740  ;;  %v1001_v42 = vmul.f32 0.005, %v937_v54  ;;  %v810_v56 = vsub.f32 %v3273_v0, %v746_v26  ;;  %v3276_v26 = vld [vmem:[#allocation16_spill] sm:$0xff] }
 0x138   :  { %v1033_v60 = vmul.f32 0.005, %v969_v62  ;;  %v842_v9 = vsub.f32 %v3274_v3, %v778_v27  ;;  %v811_v32 = vsub.f32 %v3275_v18, %v747_v2  ;;  %v779_v13 = vmul.f32 2.0, %v440_v38  ;;  %v2548_v33 = vpop.eup %1742  ;;  %v3277_v3 = vld [vmem:[#allocation13_spill] sm:$0xff] }
 0x139   :  { %v1153_v16 = vmul.f32 1.442695, %v1032_v1  ;;  %1343 = vadd.xlane.f32.xlu0 %v1342_v7  ;;  %1754 = vpow2.f32 %v1089_v25  ;;  %v1091_v37 = vmul.f32 1.442695, %v1001_v42  ;;  %v874_v40 = vmax.f32 %v810_v56, 0.0 }
 0x13a   :  { %v1155_v50 = vmul.f32 1.442695, %v1033_v60  ;;  %v906_v24 = vmax.f32 %v842_v9, 0.0  ;;  %v875_v39 = vmax.f32 %v811_v32, 0.0  ;;  %v843_v22 = vsub.f32 %v2427_v63, %v779_v13  ;;  %v446_v60 = vpop.f32.mrf.mxu1 }
 0x13b   :  { %v748_v29 = vmul.f32 2.0, %v346_v57  ;;  %1756 = vpow2.f32 %v1153_v16  ;;  %v938_v31 = vsub.f32 0.0, %v874_v40  ;;  %v1209_v48 = vmul.f32 0.039894227, %v2456_v47  ;;  %v2553_v41 = vpop.eup %1744 }
 0x13c   :  { %v1210_v17 = vmul.f32 0.039894227, %v2465_v61  ;;  %1758 = vpow2.f32 %v1091_v37  ;;  %v970_v5 = vsub.f32 0.0, %v906_v24  ;;  %v939_v12 = vsub.f32 0.0, %v875_v39  ;;  %v448_v39 = vpop.f32.mrf.mxu1 }
 0x13d   :  { %v907_v55 = vmax.f32 %v843_v22, 0.0  ;;  %v2555_v28 = vpop.eup %1746  ;;  %v1002_v4 = vmul.f32 0.005, %v938_v31  ;;  %1273 = vst [vmem:[#allocation2 + $0x150] sm:$0xff] %v1209_v48  ;;  %v1179_v25 = vmul.f32 0.039894227, %v2469_v35  ;;  %v812_v38 = vsub.f32 %v3276_v26, %v748_v29 }
 0x13e   :  { %1274 = vst [vmem:[#allocation2 + $0x158] sm:$0xff] %v1210_v17  ;;  %v1390_v63 = vadd.f32 %v1210_v17, %v1209_v48  ;;  %v1180_v47 = vmul.f32 0.039894227, %v2475_v49  ;;  %v1034_v54 = vmul.f32 0.005, %v970_v5  ;;  %v780_v2 = vmul.f32 2.0, %v442_v46 }
 0x13f   :  { %v1003_v61 = vmul.f32 0.005, %v939_v12  ;;  %v971_v62 = vsub.f32 0.0, %v907_v55  ;;  %v2560_v1 = vpop.eup %1748  ;;  %v1093_v7 = vmul.f32 1.442695, %v1002_v4  ;;  %1243 = vst [vmem:[#allocation2 + $0x60] sm:$0xff] %v1179_v25  ;;  %1760 = vpow2.f32 %v1155_v50  ;;  %v352_v50 = vpop.f32.mrf.mxu0 }
 0x140   :  { %1391 = vadd.xlane.f32.xlu0 %v1390_v63  ;;  %v1345_v27 = vadd.f32 %v1180_v47, %v1179_v25  ;;  %1244 = vst [vmem:[#allocation2 + $0x68] sm:$0xff] %v1180_v47  ;;  %v749_v42 = vmul.f32 2.0, %v350_v19  ;;  %v2562_v0 = vpop.eup %1750  ;;  %v1157_v35 = vmul.f32 1.442695, %v1034_v54  ;;  %v876_v57 = vmax.f32 %v812_v38, 0.0  ;;  %v3278_v29 = vld [vmem:[#allocation25_spill] sm:$0xff] }
 0x141   :  { %v1095_v49 = vmul.f32 1.442695, %v1003_v61  ;;  %v1035_v56 = vmul.f32 0.005, %v971_v62  ;;  %1762 = vpow2.f32 %v1093_v7  ;;  %v844_v16 = vsub.f32 %v2503_v6, %v780_v2  ;;  %v3279_v62 = vld [vmem:[#allocation14_spill] sm:$0xff] }
 0x142   :  { %1346 = vadd.xlane.f32.xlu1 %v1345_v27  ;;  %v813_v9 = vsub.f32 %v3277_v3, %v749_v42  ;;  %1764 = vpow2.f32 %v1157_v35  ;;  %v781_v32 = vmul.f32 2.0, %v446_v60  ;;  %v1211_v13 = vmul.f32 0.039894227, %v2473_v53 }
 0x143   :  { %v1159_v18 = vmul.f32 1.442695, %v1035_v56  ;;  %1766 = vpow2.f32 %v1095_v49  ;;  %v940_v37 = vsub.f32 0.0, %v876_v57  ;;  %v908_v40 = vmax.f32 %v844_v16, 0.0  ;;  %v2567_v22 = vpop.eup %1752 }
 0x144   :  { %v877_v24 = vmax.f32 %v813_v9, 0.0  ;;  %v845_v31 = vsub.f32 %v3278_v29, %v781_v32  ;;  %v1212_v6 = vmul.f32 0.039894227, %v2477_v14  ;;  %1275 = vst [vmem:[#allocation2 + $0x160] sm:$0xff] %v1211_v13  ;;  %v1181_v48 = vmul.f32 0.039894227, %v2482_v45 }
 0x145   :  { %1768 = vpow2.f32 %v1159_v18  ;;  %v1004_v17 = vmul.f32 0.005, %v940_v37  ;;  %v972_v46 = vsub.f32 0.0, %v908_v40  ;;  %v1182_v53 = vmul.f32 0.039894227, %v2490_v34 }
 0x146   :  { %v941_v5 = vsub.f32 0.0, %v877_v24  ;;  %v2573_v12 = vpop.eup %1754  ;;  %v909_v55 = vmax.f32 %v845_v31, 0.0  ;;  %1276 = vst [vmem:[#allocation2 + $0x168] sm:$0xff] %v1212_v6  ;;  %v1393_v19 = vadd.f32 %v1212_v6, %v1211_v13  ;;  %1245 = vst [vmem:[#allocation2 + $0x70] sm:$0xff] %v1181_v48  ;;  %v750_v4 = vmul.f32 2.0, %v352_v50 }
 0x147   :  { %v782_v63 = vmul.f32 2.0, %v448_v39  ;;  %v1097_v25 = vmul.f32 1.442695, %v1004_v17  ;;  %v1036_v47 = vmul.f32 0.005, %v972_v46  ;;  %v1348_v14 = vadd.f32 %v1182_v53, %v1181_v48  ;;  %1246 = vst [vmem:[#allocation2 + $0x78] sm:$0xff] %v1182_v53 }
 0x148   :  { %v1005_v54 = vmul.f32 0.005, %v941_v5  ;;  %v2575_v61 = vpop.eup %1756  ;;  %v973_v45 = vsub.f32 0.0, %v909_v55  ;;  %1394 = vadd.xlane.f32.xlu1 %v1393_v19  ;;  %v814_v26 = vsub.f32 %v3279_v62, %v750_v4  ;;  %v1213_v38 = vmul.f32 0.039894227, %v2484_v23 }
 0x149   :  { %v846_v34 = vsub.f32 %v2396_v15, %v782_v63  ;;  %v2580_v7 = vpop.eup %1758  ;;  %1770 = vpow2.f32 %v1097_v25  ;;  %v1161_v27 = vmul.f32 1.442695, %v1036_v47  ;;  %1349 = vadd.xlane.f32.xlu0 %v1348_v14  ;;  %v1214_v42 = vmul.f32 0.039894227, %v2495_v21 }
 0x14a   :  { %v1099_v2 = vmul.f32 1.442695, %v1005_v54  ;;  %v1037_v60 = vmul.f32 0.005, %v973_v45  ;;  %v878_v35 = vmax.f32 %v814_v26, 0.0  ;;  %1277 = vst [vmem:[#allocation2 + $0x170] sm:$0xff] %v1213_v38 }
 0x14b   :  { %v910_v49 = vmax.f32 %v846_v34, 0.0  ;;  %v1183_v56 = vmul.f32 0.039894227, %v2498_v10  ;;  %1772 = vpow2.f32 %v1161_v27  ;;  %1278 = vst [vmem:[#allocation2 + $0x178] sm:$0xff] %v1214_v42  ;;  %v1396_v57 = vadd.f32 %v1214_v42, %v1213_v38 }
 0x14c   :  { %v1184_v15 = vmul.f32 0.039894227, %v2509_v36  ;;  %v1215_v23 = vmul.f32 0.039894227, %v2505_v52  ;;  %1774 = vpow2.f32 %v1099_v2  ;;  %v1163_v16 = vmul.f32 1.442695, %v1037_v60  ;;  %v1761_v18 = vpop.eup %1760 }
 0x14d   :  { %v942_v3 = vsub.f32 0.0, %v878_v35  ;;  %v974_v9 = vsub.f32 0.0, %v910_v49  ;;  %1247 = vst [vmem:[#allocation2 + $0x80] sm:$0xff] %v1183_v56  ;;  %1397 = vadd.xlane.f32.xlu0 %v1396_v57  ;;  %v1216_v32 = vmul.f32 0.039894227, %v2511_v51  ;;  %v3280_v26 = vmov 0.0  }
 0x14e   :  { %v1351_v21 = vadd.f32 %v1184_v15, %v1183_v56  ;;  %1248 = vst [vmem:[#allocation2 + $0x88] sm:$0xff] %v1184_v15  ;;  %1279 = vst [vmem:[#allocation2 + $0x180] sm:$0xff] %v1215_v23  ;;  %v1185_v10 = vmul.f32 0.039894227, %v2515_v20  ;;  %v1186_v13 = vmul.f32 0.039894227, %v2524_v43  ;;  %v1763_v37 = vpop.eup %1762  ;;  %1776 = vpow2.f32 %v1163_v16 }
 0x14f   :  { %v1006_v36 = vmul.f32 0.005, %v942_v3  ;;  %v1038_v52 = vmul.f32 0.005, %v974_v9  ;;  %v1217_v40 = vmul.f32 0.039894227, %v2517_v59  ;;  %v1765_v24 = vpop.eup %1764  ;;  %v1399_v50 = vadd.f32 %v1216_v32, %v1215_v23 }
 0x150   :  { %1352 = vadd.xlane.f32.xlu1 %v1351_v21  ;;  %1280 = vst [vmem:[#allocation2 + $0x188] sm:$0xff] %v1216_v32  ;;  %1249 = vst [vmem:[#allocation2 + $0x90] sm:$0xff] %v1185_v10  ;;  %v1354_v39 = vadd.f32 %v1186_v13, %v1185_v10  ;;  %v1218_v51 = vmul.f32 0.039894227, %v2527_v8  ;;  %v1187_v29 = vmul.f32 0.039894227, %v2531_v11  ;;  %v1767_v20 = vpop.eup %1766 }
 0x151   :  { %1250 = vst [vmem:[#allocation2 + $0x98] sm:$0xff] %v1186_v13  ;;  %v1101_v31 = vmul.f32 1.442695, %v1006_v36  ;;  %v1165_v43 = vmul.f32 1.442695, %v1038_v52  ;;  %1281 = vst [vmem:[#allocation2 + $0x190] sm:$0xff] %v1217_v40 }
 0x152   :  { %v1188_v6 = vmul.f32 0.039894227, %v2541_v58  ;;  %v1769_v48 = vpop.eup %1768  ;;  %1355 = vadd.xlane.f32.xlu0 %v1354_v39  ;;  %1282 = vst [vmem:[#allocation2 + $0x198] sm:$0xff] %v1218_v51  ;;  %v1402_v59 = vadd.f32 %v1218_v51, %v1217_v40  ;;  %1251 = vst [vmem:[#allocation2 + $0xa0] sm:$0xff] %v1187_v29  ;;  %v1219_v17 = vmul.f32 0.039894227, %v2537_v44 }
 0x153   :  { %v1220_v46 = vmul.f32 0.039894227, %v2543_v30  ;;  %v1189_v5 = vmul.f32 0.039894227, %v2548_v33  ;;  %1778 = vpow2.f32 %v1101_v31  ;;  %v1190_v11 = vmul.f32 0.039894227, %v2555_v28 }
 0x154   :  { %v1357_v8 = vadd.f32 %v1188_v6, %v1187_v29  ;;  %1252 = vst [vmem:[#allocation2 + $0xa8] sm:$0xff] %v1188_v6  ;;  %v1221_v53 = vmul.f32 0.039894227, %v2553_v41  ;;  %1780 = vpow2.f32 %v1165_v43  ;;  %1400 = vadd.xlane.f32.xlu1 %v1399_v50  ;;  %1283 = vst [vmem:[#allocation2 + $0x1a0] sm:$0xff] %v1219_v17  ;;  %v1222_v44 = vmul.f32 0.039894227, %v2560_v1 }
 0x155   :  { %1284 = vst [vmem:[#allocation2 + $0x1a8] sm:$0xff] %v1220_v46  ;;  %v2598_v58 = vadd.f32 %v1220_v46, %v1219_v17  ;;  %1253 = vst [vmem:[#allocation2 + $0xb0] sm:$0xff] %v1189_v5  ;;  %v1191_v30 = vmul.f32 0.039894227, %v2562_v0  ;;  %v2602_v55 = vadd.f32 %v1190_v11, %v1189_v5  ;;  %v1192_v33 = vmul.f32 0.039894227, %v2573_v12 }
 0x156   :  { %1254 = vst [vmem:[#allocation2 + $0xb8] sm:$0xff] %v1190_v11  ;;  %1285 = vst [vmem:[#allocation2 + $0x1b0] sm:$0xff] %v1221_v53  ;;  %v1223_v28 = vmul.f32 0.039894227, %v2567_v22  ;;  %v1224_v41 = vmul.f32 0.039894227, %v2575_v61  ;;  %1403 = vadd.xlane.f32.xlu0 %v1402_v59  ;;  %v2607_v19 = vadd.f32 %v1222_v44, %v1221_v53  ;;  %v1771_v0 = vpop.eup %1770 }
 0x157   :  { %1286 = vst [vmem:[#allocation2 + $0x1b8] sm:$0xff] %v1222_v44  ;;  %1255 = vst [vmem:[#allocation2 + $0xc0] sm:$0xff] %v1191_v30  ;;  %v1193_v4 = vmul.f32 0.039894227, %v2580_v7  ;;  %v1194_v1 = vmul.f32 0.039894227, %v1763_v37  ;;  %v2610_v25 = vadd.f32 %v1192_v33, %v1191_v30 }
 0x158   :  { %v1225_v63 = vmul.f32 0.039894227, %v1761_v18  ;;  %1256 = vst [vmem:[#allocation2 + $0xc8] sm:$0xff] %v1192_v33  ;;  %1287 = vst [vmem:[#allocation2 + $0x1c0] sm:$0xff] %v1223_v28  ;;  %v2612_v12 = vadd.f32 %v1224_v41, %v1223_v28  ;;  %v1226_v22 = vmul.f32 0.039894227, %v1765_v24  ;;  %1358 = vadd.xlane.f32.xlu1 %v1357_v8  ;;  %v1773_v45 = vpop.eup %1772 }
 0x159   :  { %1288 = vst [vmem:[#allocation2 + $0x1c8] sm:$0xff] %v1224_v41  ;;  %v1195_v47 = vmul.f32 0.039894227, %v1767_v20  ;;  %1257 = vst [vmem:[#allocation2 + $0xd0] sm:$0xff] %v1193_v4  ;;  %v1366_v54 = vadd.f32 %v1194_v1, %v1193_v4  ;;  %v1196_v14 = vmul.f32 0.039894227, %v1771_v0  ;;  %v1775_v34 = vpop.eup %1774 }
 0x15a   :  { %1258 = vst [vmem:[#allocation2 + $0xd8] sm:$0xff] %v1194_v1  ;;  %1289 = vst [vmem:[#allocation2 + $0x1d0] sm:$0xff] %v1225_v63  ;;  %v1227_v61 = vmul.f32 0.039894227, %v1769_v48  ;;  %v1414_v62 = vadd.f32 %v1226_v22, %v1225_v63  ;;  %1361 = vadd.xlane.f32.xlu0 %v2602_v55  ;;  %v1228_v7 = vmul.f32 0.039894227, %v1773_v45 }
 0x15b   :  { %1290 = vst [vmem:[#allocation2 + $0x1d8] sm:$0xff] %v1226_v22  ;;  %1259 = vst [vmem:[#allocation2 + $0xe0] sm:$0xff] %v1195_v47  ;;  %v1369_v38 = vadd.f32 %v1196_v14, %v1195_v47  ;;  %v1197_v27 = vmul.f32 0.039894227, %v1775_v34  ;;  %v1777_v2 = vpop.eup %1776 }
 0x15c   :  { %41 = vst.msk [vmem:[%s3235_s5 + $0x80] sm:$0xff] %vm24_vm1, %v3280_v26  ;;  %25 = vst.msk [vmem:[%s3235_s5] sm:$0xff] %vm24_vm1, %v3280_v26  ;;  %1406 = vadd.xlane.f32.xlu1 %v2598_v58  ;;  %v1417_v42 = vadd.f32 %v1228_v7, %v1227_v61  ;;  %v1229_v60 = vmul.f32 0.039894227, %v1777_v2 }
 0x15d   :  { %26 = vst.msk [vmem:[%s3235_s5 + $0x8] sm:$0xff] %vm24_vm1, %v3280_v26  ;;  %27 = vst.msk [vmem:[%s3235_s5 + $0x10] sm:$0xff] %vm24_vm1, %v3280_v26 }
 0x15e   :  { %28 = vst.msk [vmem:[%s3235_s5 + $0x18] sm:$0xff] %vm24_vm1, %v3280_v26  ;;  %29 = vst.msk [vmem:[%s3235_s5 + $0x20] sm:$0xff] %vm24_vm1, %v3280_v26  ;;  %1409 = vadd.xlane.f32.xlu0 %v2607_v19 }
 0x15f   :  { %30 = vst.msk [vmem:[%s3235_s5 + $0x28] sm:$0xff] %vm24_vm1, %v3280_v26  ;;  %31 = vst.msk [vmem:[%s3235_s5 + $0x30] sm:$0xff] %vm24_vm1, %v3280_v26 }
 0x160   :  { %32 = vst.msk [vmem:[%s3235_s5 + $0x38] sm:$0xff] %vm24_vm1, %v3280_v26  ;;  %33 = vst.msk [vmem:[%s3235_s5 + $0x40] sm:$0xff] %vm24_vm1, %v3280_v26  ;;  %v1779_v35 = vpop.eup %1778  ;;  %1364 = vadd.xlane.f32.xlu1 %v2610_v25 }
 0x161   :  { %34 = vst.msk [vmem:[%s3235_s5 + $0x48] sm:$0xff] %vm24_vm1, %v3280_v26  ;;  %35 = vst.msk [vmem:[%s3235_s5 + $0x50] sm:$0xff] %vm24_vm1, %v3280_v26  ;;  %v1781_v49 = vpop.eup %1780  ;;  %v1198_v56 = vmul.f32 0.039894227, %v1779_v35 }
 0x162   :  { %36 = vst.msk [vmem:[%s3235_s5 + $0x58] sm:$0xff] %vm24_vm1, %v3280_v26  ;;  %37 = vst.msk [vmem:[%s3235_s5 + $0x60] sm:$0xff] %vm24_vm1, %v3280_v26  ;;  %1367 = vadd.xlane.f32.xlu0 %v1366_v54  ;;  %v1230_v57 = vmul.f32 0.039894227, %v1781_v49 }
 0x163   :  { %38 = vst.msk [vmem:[%s3235_s5 + $0x68] sm:$0xff] %vm24_vm1, %v3280_v26  ;;  %39 = vst.msk [vmem:[%s3235_s5 + $0x70] sm:$0xff] %vm24_vm1, %v3280_v26  ;;  %v1372_v15 = vadd.f32 %v1198_v56, %v1197_v27 }
 0x164   :  { %40 = vst.msk [vmem:[%s3235_s5 + $0x78] sm:$0xff] %vm24_vm1, %v3280_v26  ;;  %42 = vst.msk [vmem:[%s3235_s5 + $0x88] sm:$0xff] %vm24_vm1, %v3280_v26  ;;  %1412 = vadd.xlane.f32.xlu1 %v2612_v12  ;;  %v1420_v23 = vadd.f32 %v1230_v57, %v1229_v60 }
 0x165   :  { %43 = vst.msk [vmem:[%s3235_s5 + $0x90] sm:$0xff] %vm24_vm1, %v3280_v26  ;;  %44 = vst.msk [vmem:[%s3235_s5 + $0x98] sm:$0xff] %vm24_vm1, %v3280_v26 }
 0x166   :  { %45 = vst.msk [vmem:[%s3235_s5 + $0xa0] sm:$0xff] %vm24_vm1, %v3280_v26  ;;  %46 = vst.msk [vmem:[%s3235_s5 + $0xa8] sm:$0xff] %vm24_vm1, %v3280_v26  ;;  %1415 = vadd.xlane.f32.xlu0 %v1414_v62 }
 0x167   :  { %47 = vst.msk [vmem:[%s3235_s5 + $0xb0] sm:$0xff] %vm24_vm1, %v3280_v26  ;;  %48 = vst.msk [vmem:[%s3235_s5 + $0xb8] sm:$0xff] %vm24_vm1, %v3280_v26 }
 0x168   :  { %49 = vst.msk [vmem:[%s3235_s5 + $0xc0] sm:$0xff] %vm24_vm1, %v3280_v26  ;;  %50 = vst.msk [vmem:[%s3235_s5 + $0xc8] sm:$0xff] %vm24_vm1, %v3280_v26  ;;  %1370 = vadd.xlane.f32.xlu1 %v1369_v38 }
 0x169   :  { %51 = vst.msk [vmem:[%s3235_s5 + $0xd0] sm:$0xff] %vm24_vm1, %v3280_v26  ;;  %52 = vst.msk [vmem:[%s3235_s5 + $0xd8] sm:$0xff] %vm24_vm1, %v3280_v26 }
 0x16a   :  { %53 = vst.msk [vmem:[%s3235_s5 + $0xe0] sm:$0xff] %vm24_vm1, %v3280_v26  ;;  %54 = vst.msk [vmem:[%s3235_s5 + $0xe8] sm:$0xff] %vm24_vm1, %v3280_v26  ;;  %1373 = vadd.xlane.f32.xlu0 %v1372_v15 }
 0x16b   :  { %55 = vst.msk [vmem:[%s3235_s5 + $0xf0] sm:$0xff] %vm24_vm1, %v3280_v26  ;;  %56 = vst.msk [vmem:[%s3235_s5 + $0xf8] sm:$0xff] %vm24_vm1, %v3280_v26 }
 0x16c   :  { %1260 = vst [vmem:[#allocation2 + $0xe8] sm:$0xff] %v1196_v14  ;;  %1291 = vst [vmem:[#allocation2 + $0x1e0] sm:$0xff] %v1227_v61  ;;  %1418 = vadd.xlane.f32.xlu1 %v1417_v42 }
 0x16d   :  { %1292 = vst [vmem:[#allocation2 + $0x1e8] sm:$0xff] %v1228_v7  ;;  %1261 = vst [vmem:[#allocation2 + $0xf0] sm:$0xff] %v1197_v27 }
 0x16e   :  { %1293 = vst [vmem:[#allocation2 + $0x1f0] sm:$0xff] %v1229_v60  ;;  %1262 = vst [vmem:[#allocation2 + $0xf8] sm:$0xff] %v1198_v56  ;;  %1421 = vadd.xlane.f32.xlu0 %v1420_v23 }
 0x16f   :  { %1294 = vst [vmem:[#allocation2 + $0x1f8] sm:$0xff] %v1230_v57 }
 0x170   :  { %1857 = shalt.err (!%p1854_p4)
}
 0x171   :  { %s1871_s15 = smov 256   ;;  %s1872_s16 = smov 16   ;;  %v1311_v16 = vld [vmem:[%s3235_s5 + $0x80] sm:$0xff]  ;;  %v1312_v10 = vld [vmem:[%s3235_s5 + $0x88] sm:$0xff]  ;;  %v1313_v39 = vld [vmem:[%s3235_s5 + $0x90] sm:$0xff] }
 0x172   :  { %1598 = dma.vmem_to_hbm [thread:$0]  %s1593_s13, 8192, %s3234_s4, [#allocation3], %s1871_s15, %s1871_s15, %s1872_s16  }
 0x173   :  { %v1295_v18 = vld [vmem:[%s3235_s5] sm:$0xff]  ;;  %v1296_v37 = vld [vmem:[%s3235_s5 + $0x8] sm:$0xff]  ;;  %v1297_v29 = vld [vmem:[%s3235_s5 + $0x10] sm:$0xff] }
 0x174   :  { %v1298_v17 = vld [vmem:[%s3235_s5 + $0x18] sm:$0xff]  ;;  %v1299_v28 = vld [vmem:[%s3235_s5 + $0x20] sm:$0xff]  ;;  %v1300_v25 = vld [vmem:[%s3235_s5 + $0x28] sm:$0xff] }
 0x175   :  { %v1314_v44 = vld [vmem:[%s3235_s5 + $0x98] sm:$0xff]  ;;  %v1315_v1 = vld [vmem:[%s3235_s5 + $0xa0] sm:$0xff]  ;;  %v1316_v45 = vld [vmem:[%s3235_s5 + $0xa8] sm:$0xff] }
 0x176   :  { %v1301_v34 = vld [vmem:[%s3235_s5 + $0x30] sm:$0xff]  ;;  %v1302_v49 = vld [vmem:[%s3235_s5 + $0x38] sm:$0xff] }
 0x177   :  { %v1317_v35 = vld [vmem:[%s3235_s5 + $0xb0] sm:$0xff] }
 0x195   :  { %v1377_v3 = vpop.xlane.xlu1 %1376 }
 0x196   :  { %v1439_v9 = vadd.f32 %v1377_v3, %v1311_v16 }
 0x198   :  { %1472 = vst.msk [vmem:[%s3235_s5 + $0x80] sm:$0xff] %vm24_vm1, %v1439_v9  ;;  %v1329_v21 = vpop.xlane.xlu0 %1328 }
 0x199   :  { %v1423_v32 = vadd.f32 %v1329_v21, %v1295_v18  ;;  %v1318_v18 = vld [vmem:[%s3235_s5 + $0xb8] sm:$0xff] }
 0x19b   :  { %1456 = vst.msk [vmem:[%s3235_s5] sm:$0xff] %vm24_vm1, %v1423_v32  ;;  %v1303_v32 = vld [vmem:[%s3235_s5 + $0x40] sm:$0xff] }
 0x19d   :  { %v1380_v13 = vpop.xlane.xlu0 %1379 }
 0x19e   :  { %v1440_v36 = vadd.f32 %v1380_v13, %v1312_v10 }
 0x19f   :  { %v1507_v52 = vld [vmem:[%s3235_s5 + $0x80] sm:$0xff]  ;;  %v1332_v40 = vpop.xlane.xlu1 %1331 }
 0x1a0   :  { %1782 = vrsqrt.f32 %v1507_v52  ;;  %1473 = vst.msk [vmem:[%s3235_s5 + $0x88] sm:$0xff] %vm24_vm1, %v1440_v36  ;;  %v1424_v24 = vadd.f32 %v1332_v40, %v1296_v37  ;;  %v1304_v36 = vld [vmem:[%s3235_s5 + $0x48] sm:$0xff] }
 0x1a2   :  { %v1491_v50 = vld [vmem:[%s3235_s5] sm:$0xff]  ;;  %1457 = vst.msk [vmem:[%s3235_s5 + $0x8] sm:$0xff] %vm24_vm1, %v1424_v24 }
 0x1a3   :  { %1784 = vrsqrt.f32 %v1491_v50  ;;  %v1319_v24 = vld [vmem:[%s3235_s5 + $0xc0] sm:$0xff] }
 0x1a6   :  { %v1383_v51 = vpop.xlane.xlu1 %1382 }
 0x1a7   :  { %v1508_v20 = vld [vmem:[%s3235_s5 + $0x88] sm:$0xff]  ;;  %v1441_v31 = vadd.f32 %v1383_v51, %v1313_v39 }
 0x1a8   :  { %1786 = vrsqrt.f32 %v1508_v20  ;;  %v1335_v43 = vpop.xlane.xlu0 %1334 }
 0x1a9   :  { %v1492_v6 = vld [vmem:[%s3235_s5 + $0x8] sm:$0xff]  ;;  %1474 = vst.msk [vmem:[%s3235_s5 + $0x90] sm:$0xff] %vm24_vm1, %v1441_v31  ;;  %v1425_v48 = vadd.f32 %v1335_v43, %v1297_v29 }
 0x1aa   :  { %1788 = vrsqrt.f32 %v1492_v6  ;;  %v1320_v31 = vld [vmem:[%s3235_s5 + $0xc8] sm:$0xff] }
 0x1ab   :  { %1458 = vst.msk [vmem:[%s3235_s5 + $0x10] sm:$0xff] %vm24_vm1, %v1425_v48  ;;  %v1305_v48 = vld [vmem:[%s3235_s5 + $0x50] sm:$0xff] }
 0x1ad   :  { %v1783_v59 = vpop.eup %1782 }
 0x1ae   :  { %1571 = vst.msk [vmem:[%s3235_s5 + $0x80] sm:$0xff] %vm24_vm1, %v1783_v59 }
 0x1b0   :  { %v1785_v46 = vpop.eup %1784  ;;  %v1509_v5 = vld [vmem:[%s3235_s5 + $0x90] sm:$0xff]  ;;  %v1338_v8 = vpop.xlane.xlu0 %1337 }
 0x1b1   :  { %1555 = vst.msk [vmem:[%s3235_s5] sm:$0xff] %vm24_vm1, %v1785_v46  ;;  %1790 = vrsqrt.f32 %v1509_v5  ;;  %v1426_v11 = vadd.f32 %v1338_v8, %v1298_v17  ;;  %v1306_v8 = vld [vmem:[%s3235_s5 + $0x58] sm:$0xff] }
 0x1b2   :  { %v1493_v53 = vld [vmem:[%s3235_s5 + $0x10] sm:$0xff] }
 0x1b3   :  { %1792 = vrsqrt.f32 %v1493_v53  ;;  %1459 = vst.msk [vmem:[%s3235_s5 + $0x18] sm:$0xff] %vm24_vm1, %v1426_v11 }
 0x1b5   :  { %v1787_v58 = vpop.eup %1786 }
 0x1b6   :  { %1572 = vst.msk [vmem:[%s3235_s5 + $0x88] sm:$0xff] %vm24_vm1, %v1787_v58 }
 0x1b7   :  { %v1789_v30 = vpop.eup %1788 }
 0x1b8   :  { %v1386_v55 = vpop.xlane.xlu0 %1385  ;;  %1556 = vst.msk [vmem:[%s3235_s5 + $0x8] sm:$0xff] %vm24_vm1, %v1789_v30 }
 0x1b9   :  { %v1442_v33 = vadd.f32 %v1386_v55, %v1314_v44  ;;  %v1321_v44 = vld [vmem:[%s3235_s5 + $0xd0] sm:$0xff] }
 0x1ba   :  { %v1494_v41 = vld [vmem:[%s3235_s5 + $0x18] sm:$0xff] }
 0x1bb   :  { %1475 = vst.msk [vmem:[%s3235_s5 + $0x98] sm:$0xff] %vm24_vm1, %v1442_v33  ;;  %1794 = vrsqrt.f32 %v1494_v41  ;;  %v1341_v19 = vpop.xlane.xlu1 %1340  ;;  %v1322_v41 = vld [vmem:[%s3235_s5 + $0xd8] sm:$0xff] }
 0x1bc   :  { %v1427_v4 = vadd.f32 %v1341_v19, %v1299_v28 }
 0x1be   :  { %v1791_v63 = vpop.eup %1790  ;;  %1460 = vst.msk [vmem:[%s3235_s5 + $0x20] sm:$0xff] %vm24_vm1, %v1427_v4 }
 0x1bf   :  { %1573 = vst.msk [vmem:[%s3235_s5 + $0x90] sm:$0xff] %vm24_vm1, %v1791_v63  ;;  %v1389_v0 = vpop.xlane.xlu1 %1388  ;;  %v1307_v63 = vld [vmem:[%s3235_s5 + $0x60] sm:$0xff] }
 0x1c0   :  { %v1793_v12 = vpop.eup %1792  ;;  %v1443_v22 = vadd.f32 %v1389_v0, %v1315_v1 }
 0x1c1   :  { %1557 = vst.msk [vmem:[%s3235_s5 + $0x10] sm:$0xff] %vm24_vm1, %v1793_v12 }
 0x1c2   :  { %v1510_v47 = vld [vmem:[%s3235_s5 + $0x98] sm:$0xff]  ;;  %v1344_v54 = vpop.xlane.xlu0 %1343  ;;  %1476 = vst.msk [vmem:[%s3235_s5 + $0xa0] sm:$0xff] %vm24_vm1, %v1443_v22  ;;  %v1308_v22 = vld [vmem:[%s3235_s5 + $0x68] sm:$0xff] }
 0x1c3   :  { %1796 = vrsqrt.f32 %v1510_v47  ;;  %v1428_v14 = vadd.f32 %v1344_v54, %v1300_v25 }
 0x1c5   :  { %1461 = vst.msk [vmem:[%s3235_s5 + $0x28] sm:$0xff] %vm24_vm1, %v1428_v14  ;;  %v1495_v61 = vld [vmem:[%s3235_s5 + $0x20] sm:$0xff] }
 0x1c6   :  { %1798 = vrsqrt.f32 %v1495_v61 }
 0x1c8   :  { %v1795_v62 = vpop.eup %1794 }
 0x1c9   :  { %v1392_v26 = vpop.xlane.xlu0 %1391  ;;  %1558 = vst.msk [vmem:[%s3235_s5 + $0x18] sm:$0xff] %vm24_vm1, %v1795_v62  ;;  %v1511_v38 = vld [vmem:[%s3235_s5 + $0xa0] sm:$0xff] }
 0x1ca   :  { %v1444_v7 = vadd.f32 %v1392_v26, %v1316_v45  ;;  %1800 = vrsqrt.f32 %v1511_v38  ;;  %v1323_v45 = vld [vmem:[%s3235_s5 + $0xe0] sm:$0xff] }
 0x1cb   :  { %v1347_v27 = vpop.xlane.xlu1 %1346 }
 0x1cc   :  { %v1496_v2 = vld [vmem:[%s3235_s5 + $0x28] sm:$0xff]  ;;  %1477 = vst.msk [vmem:[%s3235_s5 + $0xa8] sm:$0xff] %vm24_vm1, %v1444_v7  ;;  %v1429_v42 = vadd.f32 %v1347_v27, %v1301_v34 }
 0x1cd   :  { %1802 = vrsqrt.f32 %v1496_v2  ;;  %v1324_v7 = vld [vmem:[%s3235_s5 + $0xe8] sm:$0xff] }
 0x1ce   :  { %1462 = vst.msk [vmem:[%s3235_s5 + $0x30] sm:$0xff] %vm24_vm1, %v1429_v42 }
 0x1d0   :  { %v1797_v60 = vpop.eup %1796 }
 0x1d1   :  { %1574 = vst.msk [vmem:[%s3235_s5 + $0x98] sm:$0xff] %vm24_vm1, %v1797_v60  ;;  %v1395_v56 = vpop.xlane.xlu1 %1394 }
 0x1d2   :  { %v1445_v15 = vadd.f32 %v1395_v56, %v1317_v35  ;;  %v1350_v23 = vpop.xlane.xlu0 %1349  ;;  %v1309_v35 = vld [vmem:[%s3235_s5 + $0x70] sm:$0xff] }
 0x1d3   :  { %v1512_v57 = vld [vmem:[%s3235_s5 + $0xa8] sm:$0xff]  ;;  %v1799_v16 = vpop.eup %1798  ;;  %v1430_v3 = vadd.f32 %v1350_v23, %v1302_v49  ;;  %v1310_v23 = vld [vmem:[%s3235_s5 + $0x78] sm:$0xff] }
 0x1d4   :  { %1804 = vrsqrt.f32 %v1512_v57  ;;  %1559 = vst.msk [vmem:[%s3235_s5 + $0x20] sm:$0xff] %vm24_vm1, %v1799_v16  ;;  %1478 = vst.msk [vmem:[%s3235_s5 + $0xb0] sm:$0xff] %vm24_vm1, %v1445_v15 }
 0x1d5   :  { %v1497_v9 = vld [vmem:[%s3235_s5 + $0x30] sm:$0xff]  ;;  %1463 = vst.msk [vmem:[%s3235_s5 + $0x38] sm:$0xff] %vm24_vm1, %v1430_v3 }
 0x1d6   :  { %1806 = vrsqrt.f32 %v1497_v9  ;;  %v1398_v21 = vpop.xlane.xlu0 %1397 }
 0x1d7   :  { %v1801_v10 = vpop.eup %1800  ;;  %v1446_v13 = vadd.f32 %v1398_v21, %v1318_v18  ;;  %v1325_v18 = vld [vmem:[%s3235_s5 + $0xf0] sm:$0xff] }
 0x1d8   :  { %1575 = vst.msk [vmem:[%s3235_s5 + $0xa0] sm:$0xff] %vm24_vm1, %v1801_v10 }
 0x1d9   :  { %v1353_v37 = vpop.xlane.xlu1 %1352  ;;  %1479 = vst.msk [vmem:[%s3235_s5 + $0xb8] sm:$0xff] %vm24_vm1, %v1446_v13 }
 0x1da   :  { %v1803_v52 = vpop.eup %1802  ;;  %v1431_v40 = vadd.f32 %v1353_v37, %v1303_v32 }
 0x1db   :  { %1560 = vst.msk [vmem:[%s3235_s5 + $0x28] sm:$0xff] %vm24_vm1, %v1803_v52  ;;  %v1356_v50 = vpop.xlane.xlu0 %1355  ;;  %v1513_v39 = vld [vmem:[%s3235_s5 + $0xb0] sm:$0xff] }
 0x1dc   :  { %1464 = vst.msk [vmem:[%s3235_s5 + $0x40] sm:$0xff] %vm24_vm1, %v1431_v40  ;;  %v1432_v51 = vadd.f32 %v1356_v50, %v1304_v36  ;;  %1808 = vrsqrt.f32 %v1513_v39  ;;  %v1498_v29 = vld [vmem:[%s3235_s5 + $0x38] sm:$0xff] }
 0x1dd   :  { %v1401_v20 = vpop.xlane.xlu1 %1400  ;;  %1810 = vrsqrt.f32 %v1498_v29  ;;  %v1326_v36 = vld [vmem:[%s3235_s5 + $0xf8] sm:$0xff] }
 0x1de   :  { %v1447_v43 = vadd.f32 %v1401_v20, %v1319_v24  ;;  %1465 = vst.msk [vmem:[%s3235_s5 + $0x48] sm:$0xff] %vm24_vm1, %v1432_v51 }
 0x1df   :  { %v1404_v6 = vpop.xlane.xlu0 %1403 }
 0x1e0   :  { %1480 = vst.msk [vmem:[%s3235_s5 + $0xc0] sm:$0xff] %vm24_vm1, %v1447_v43  ;;  %v1448_v59 = vadd.f32 %v1404_v6, %v1320_v31  ;;  %v1514_v46 = vld [vmem:[%s3235_s5 + $0xb8] sm:$0xff] }
 0x1e1   :  { %v1805_v17 = vpop.eup %1804  ;;  %v1359_v5 = vpop.xlane.xlu1 %1358  ;;  %1812 = vrsqrt.f32 %v1514_v46 }
 0x1e2   :  { %1576 = vst.msk [vmem:[%s3235_s5 + $0xa8] sm:$0xff] %vm24_vm1, %v1805_v17  ;;  %1481 = vst.msk [vmem:[%s3235_s5 + $0xc8] sm:$0xff] %vm24_vm1, %v1448_v59  ;;  %v1433_v11 = vadd.f32 %v1359_v5, %v1305_v48 }
 0x1e3   :  { %v1807_v53 = vpop.eup %1806  ;;  %v1499_v58 = vld [vmem:[%s3235_s5 + $0x40] sm:$0xff]  ;;  %v1362_v30 = vpop.xlane.xlu0 %1361 }
 0x1e4   :  { %1561 = vst.msk [vmem:[%s3235_s5 + $0x30] sm:$0xff] %vm24_vm1, %v1807_v53  ;;  %1814 = vrsqrt.f32 %v1499_v58  ;;  %1466 = vst.msk [vmem:[%s3235_s5 + $0x50] sm:$0xff] %vm24_vm1, %v1433_v11  ;;  %v1434_v55 = vadd.f32 %v1362_v30, %v1306_v8 }
 0x1e5   :  { %v1500_v33 = vld [vmem:[%s3235_s5 + $0x48] sm:$0xff]  ;;  %v1407_v28 = vpop.xlane.xlu1 %1406 }
 0x1e6   :  { %1816 = vrsqrt.f32 %v1500_v33  ;;  %v1449_v19 = vadd.f32 %v1407_v28, %v1321_v44  ;;  %1467 = vst.msk [vmem:[%s3235_s5 + $0x58] sm:$0xff] %vm24_vm1, %v1434_v55 }
 0x1e7   :  { %v1515_v4 = vld [vmem:[%s3235_s5 + $0xc0] sm:$0xff]  ;;  %v1410_v1 = vpop.xlane.xlu0 %1409 }
 0x1e8   :  { %1818 = vrsqrt.f32 %v1515_v4  ;;  %1482 = vst.msk [vmem:[%s3235_s5 + $0xd0] sm:$0xff] %vm24_vm1, %v1449_v19  ;;  %v1450_v0 = vadd.f32 %v1410_v1, %v1322_v41 }
 0x1e9   :  { %v1516_v25 = vld [vmem:[%s3235_s5 + $0xc8] sm:$0xff]  ;;  %v1365_v12 = vpop.xlane.xlu1 %1364  ;;  %v1809_v47 = vpop.eup %1808 }
 0x1ea   :  { %1820 = vrsqrt.f32 %v1516_v25  ;;  %1483 = vst.msk [vmem:[%s3235_s5 + $0xd8] sm:$0xff] %vm24_vm1, %v1450_v0  ;;  %v1435_v54 = vadd.f32 %v1365_v12, %v1307_v63  ;;  %v1811_v14 = vpop.eup %1810  ;;  %1577 = vst.msk [vmem:[%s3235_s5 + $0xb0] sm:$0xff] %vm24_vm1, %v1809_v47 }
 0x1eb   :  { %v1501_v61 = vld [vmem:[%s3235_s5 + $0x50] sm:$0xff]  ;;  %v1368_v62 = vpop.xlane.xlu0 %1367  ;;  %1562 = vst.msk [vmem:[%s3235_s5 + $0x38] sm:$0xff] %vm24_vm1, %v1811_v14 }
 0x1ec   :  { %1822 = vrsqrt.f32 %v1501_v61  ;;  %1468 = vst.msk [vmem:[%s3235_s5 + $0x60] sm:$0xff] %vm24_vm1, %v1435_v54  ;;  %v1436_v26 = vadd.f32 %v1368_v62, %v1308_v22 }
 0x1ed   :  { %v1502_v34 = vld [vmem:[%s3235_s5 + $0x58] sm:$0xff]  ;;  %v1413_v38 = vpop.xlane.xlu1 %1412 }
 0x1ee   :  { %1824 = vrsqrt.f32 %v1502_v34  ;;  %v1451_v27 = vadd.f32 %v1413_v38, %v1323_v45  ;;  %1469 = vst.msk [vmem:[%s3235_s5 + $0x68] sm:$0xff] %vm24_vm1, %v1436_v26  ;;  %v1813_v2 = vpop.eup %1812 }
 0x1ef   :  { %v1517_v42 = vld [vmem:[%s3235_s5 + $0xd0] sm:$0xff]  ;;  %v1416_v60 = vpop.xlane.xlu0 %1415  ;;  %1578 = vst.msk [vmem:[%s3235_s5 + $0xb8] sm:$0xff] %vm24_vm1, %v1813_v2 }
 0x1f0   :  { %1826 = vrsqrt.f32 %v1517_v42  ;;  %1484 = vst.msk [vmem:[%s3235_s5 + $0xe0] sm:$0xff] %vm24_vm1, %v1451_v27  ;;  %v1452_v49 = vadd.f32 %v1416_v60, %v1324_v7 }
 0x1f1   :  { %v1815_v56 = vpop.eup %1814  ;;  %v1518_v57 = vld [vmem:[%s3235_s5 + $0xd8] sm:$0xff]  ;;  %v1371_v15 = vpop.xlane.xlu1 %1370 }
 0x1f2   :  { %1563 = vst.msk [vmem:[%s3235_s5 + $0x40] sm:$0xff] %vm24_vm1, %v1815_v56  ;;  %1828 = vrsqrt.f32 %v1518_v57  ;;  %1485 = vst.msk [vmem:[%s3235_s5 + $0xe8] sm:$0xff] %vm24_vm1, %v1452_v49  ;;  %v1437_v16 = vadd.f32 %v1371_v15, %v1309_v35 }
 0x1f3   :  { %v1817_v3 = vpop.eup %1816  ;;  %v1503_v9 = vld [vmem:[%s3235_s5 + $0x60] sm:$0xff]  ;;  %v1374_v21 = vpop.xlane.xlu0 %1373 }
 0x1f4   :  { %1564 = vst.msk [vmem:[%s3235_s5 + $0x48] sm:$0xff] %vm24_vm1, %v1817_v3  ;;  %1830 = vrsqrt.f32 %v1503_v9  ;;  %1470 = vst.msk [vmem:[%s3235_s5 + $0x70] sm:$0xff] %vm24_vm1, %v1437_v16  ;;  %v1438_v32 = vadd.f32 %v1374_v21, %v1310_v23 }
 0x1f5   :  { %v1819_v10 = vpop.eup %1818  ;;  %v1504_v13 = vld [vmem:[%s3235_s5 + $0x68] sm:$0xff]  ;;  %v1419_v37 = vpop.xlane.xlu1 %1418 }
 0x1f6   :  { %1579 = vst.msk [vmem:[%s3235_s5 + $0xc0] sm:$0xff] %vm24_vm1, %v1819_v10  ;;  %1832 = vrsqrt.f32 %v1504_v13  ;;  %v1453_v52 = vadd.f32 %v1419_v37, %v1325_v18  ;;  %1471 = vst.msk [vmem:[%s3235_s5 + $0x78] sm:$0xff] %vm24_vm1, %v1438_v32 }
 0x1f7   :  { %v1821_v40 = vpop.eup %1820  ;;  %v1519_v24 = vld [vmem:[%s3235_s5 + $0xe0] sm:$0xff]  ;;  %v1422_v50 = vpop.xlane.xlu0 %1421 }
 0x1f8   :  { %1580 = vst.msk [vmem:[%s3235_s5 + $0xc8] sm:$0xff] %vm24_vm1, %v1821_v40  ;;  %1834 = vrsqrt.f32 %v1519_v24  ;;  %1486 = vst.msk [vmem:[%s3235_s5 + $0xf0] sm:$0xff] %vm24_vm1, %v1453_v52  ;;  %v1454_v39 = vadd.f32 %v1422_v50, %v1326_v36 }
 0x1f9   :  { %v1823_v51 = vpop.eup %1822  ;;  %v1520_v29 = vld [vmem:[%s3235_s5 + $0xe8] sm:$0xff] }
 0x1fa   :  { %1565 = vst.msk [vmem:[%s3235_s5 + $0x50] sm:$0xff] %vm24_vm1, %v1823_v51  ;;  %1836 = vrsqrt.f32 %v1520_v29  ;;  %1487 = vst.msk [vmem:[%s3235_s5 + $0xf8] sm:$0xff] %vm24_vm1, %v1454_v39 }
 0x1fb   :  { %v1825_v20 = vpop.eup %1824  ;;  %v1505_v31 = vld [vmem:[%s3235_s5 + $0x70] sm:$0xff] }
 0x1fc   :  { %1566 = vst.msk [vmem:[%s3235_s5 + $0x58] sm:$0xff] %vm24_vm1, %v1825_v20  ;;  %1838 = vrsqrt.f32 %v1505_v31 }
 0x1fd   :  { %v1827_v43 = vpop.eup %1826  ;;  %v1506_v6 = vld [vmem:[%s3235_s5 + $0x78] sm:$0xff] }
 0x1fe   :  { %1581 = vst.msk [vmem:[%s3235_s5 + $0xd0] sm:$0xff] %vm24_vm1, %v1827_v43  ;;  %1840 = vrsqrt.f32 %v1506_v6 }
 0x1ff   :  { %v1829_v48 = vpop.eup %1828  ;;  %v1521_v59 = vld [vmem:[%s3235_s5 + $0xf0] sm:$0xff] }
 0x200   :  { %1582 = vst.msk [vmem:[%s3235_s5 + $0xd8] sm:$0xff] %vm24_vm1, %v1829_v48  ;;  %1842 = vrsqrt.f32 %v1521_v59 }
 0x201   :  { %v1831_v17 = vpop.eup %1830  ;;  %v1522_v46 = vld [vmem:[%s3235_s5 + $0xf8] sm:$0xff] }
 0x202   :  { %1567 = vst.msk [vmem:[%s3235_s5 + $0x60] sm:$0xff] %vm24_vm1, %v1831_v17  ;;  %1844 = vrsqrt.f32 %v1522_v46 }
 0x203   :  { %v1833_v5 = vpop.eup %1832 }
 0x204   :  { %1568 = vst.msk [vmem:[%s3235_s5 + $0x68] sm:$0xff] %vm24_vm1, %v1833_v5 }
 0x205   :  { %v1835_v8 = vpop.eup %1834 }
 0x206   :  { %1583 = vst.msk [vmem:[%s3235_s5 + $0xe0] sm:$0xff] %vm24_vm1, %v1835_v8 }
 0x207   :  { %v1837_v11 = vpop.eup %1836 }
 0x208   :  { %1584 = vst.msk [vmem:[%s3235_s5 + $0xe8] sm:$0xff] %vm24_vm1, %v1837_v11 }
 0x209   :  { %v1839_v53 = vpop.eup %1838 }
 0x20a   :  { %1569 = vst.msk [vmem:[%s3235_s5 + $0x70] sm:$0xff] %vm24_vm1, %v1839_v53 }
 0x20b   :  { %v1841_v58 = vpop.eup %1840 }
 0x20c   :  { %1570 = vst.msk [vmem:[%s3235_s5 + $0x78] sm:$0xff] %vm24_vm1, %v1841_v58 }
 0x20d   :  { %v1843_v44 = vpop.eup %1842 }
 0x20e   :  { %1585 = vst.msk [vmem:[%s3235_s5 + $0xf0] sm:$0xff] %vm24_vm1, %v1843_v44 }
 0x20f   :  { %v1845_v30 = vpop.eup %1844 }
 0x210   :  { %1586 = vst.msk [vmem:[%s3235_s5 + $0xf8] sm:$0xff] %vm24_vm1, %v1845_v30 }
 0x211   :  { %1866 = dma.done.wait [#allocation3], 8192  }
 0x212   :  { %1867 = vsyncadd [#allocation3], 4294959104 }
 0x213   :  { %1606 = vsyncpa [#allocation3], 1 }

</bundles_post_ra>
